<compile_context>
chip_gen: v7x
topology: tpu7x:2x2x1
jax: 0.10.0
libtpu: 0.0.40
codegen_flags: <defaults>
</compile_context>

<pallas_src>
import numpy as np
import jax
import jax.numpy as jnp
from jax.experimental import pallas as pl
from jax.experimental.pallas import tpu as pltpu

# ----------------------- config (mirrors the OmegaConf config) ---------------
N_LEVELS = 16                 # xyz_encoding_config.n_levels
N_FEATURES_PER_LEVEL = 2      # xyz_encoding_config.n_features_per_level
LOG2_HASHMAP_SIZE = 12        # small synthetic hashmap
BASE_RESOLUTION = 16
PER_LEVEL_SCALE = 1.3819128800
ENC_DIM = N_LEVELS * N_FEATURES_PER_LEVEL          # 32 = encoding.n_output_dims
INCLUDE_XYZS = True                                # forward concatenates pts*2-1
N_NEURONS = 64                # mlp_network_config.n_neurons
FEATURE_DIM = 16              # config.feature_dim
CURRENT_LEVEL = 4             # self.current_level
K_IN = 64                     # fused first-layer K: 3 xyz + 32 feat + 29 pad
TM = 512                      # points per Pallas grid step (tunable 512-2048;
                              # double-buffered tile <= ~1.5 MB, fits every
                              # generation's VMEM incl. v7x's 32 MiB scoped)


# ------------------------------- Pallas kernel --------------------------------
def sdf_mlp_kernel(xin_ref, w1_ref, b1_ref, w2_ref, b2_ref, out_ref):
    # xin_ref: (TM, 64) bf16 = [pts_c(3) | hash-feat(32) | zeros(29)]
    # w1_ref : (64, 64)  bf16 — progressive mask + (2x-1) affine folded in
    # b1_ref : (1, 64)   f32  — includes the "-sum(Wx)" affine constant
    # w2_ref : (64, 16)  bf16
    # out_ref: (TM, 16)  f32; column 0 is the SDF ("sigma")
    h = jnp.dot(xin_ref[...], w1_ref[...],
                preferred_element_type=jnp.float32) + b1_ref[...]
    # nn.Softplus(beta=100, threshold=20), evaluated in f32 (v5e has no bf16
    # VPU/EUP path; exp/log1p stay full precision on all generations).
    beta = 100.0
    hb = h * beta
    h = jnp.where(hb > 20.0, h, jnp.log1p(jnp.exp(jnp.minimum(hb, 20.0))) / beta)
    # NOTE: the (TM,16) output uses 16/128 lanes per store (masked vst); kept
    # point-major because downstream consumes (N,16) "fea"; large TM amortizes.
    out_ref[...] = (jnp.dot(h.astype(w2_ref.dtype), w2_ref[...],
                            preferred_element_type=jnp.float32)
                    + b2_ref[...]).astype(out_ref.dtype)


def run_network(xin, params, n_valid):
    """xin: (Np, 64) bf16 tile-aligned input slab; returns (n_valid, 16) f32."""
    w1, b1, w2, b2 = params
    Np = xin.shape[0]
    out = pl.pallas_call(
        sdf_mlp_kernel,
        out_shape=jax.ShapeDtypeStruct((Np, FEATURE_DIM), jnp.float32),
        grid=(Np // TM,),
        in_specs=[
            pl.BlockSpec((TM, K_IN), lambda i: (i, 0)),
            pl.BlockSpec((K_IN, N_NEURONS), lambda i: (0, 0)),
            pl.BlockSpec((1, N_NEURONS), lambda i: (0, 0)),
            pl.BlockSpec((N_NEURONS, FEATURE_DIM), lambda i: (0, 0)),
            pl.BlockSpec((1, FEATURE_DIM), lambda i: (0, 0)),
        ],
        out_specs=pl.BlockSpec((TM, FEATURE_DIM), lambda i: (i, 0)),
        compiler_params=pltpu.CompilerParams(dimension_semantics=("parallel",)),
    )(xin, w1, b1, w2, b2)
    return out[:n_valid]


# ---------------- host-side first-layer fusion (free pre-computation) --------
def fuse_first_layer(w1, b1, mask):
    """Fold (pts*2-1) affine and progressive mask into W1/b1.

    (2p-1)@Wx + (f*m)@Wf + b1
      == [p | f | 0] @ concat([2*Wx, m[:,None]*Wf, 0]) + (b1 - sum(Wx, axis=0))
    """
    wx = w1[:3]                       # (3, 64) xyz rows
    wf = w1[3:]                       # (32, 64) feature rows
    w_fused = jnp.concatenate(
        [2.0 * wx,
         mask[:, None] * wf,
         jnp.zeros((K_IN - 3 - ENC_DIM, N_NEURONS), jnp.float32)], axis=0)
    b_fused = b1 - jnp.sum(wx, axis=0, keepdims=True)
    return w_fused.astype(jnp.bfloat16), b_fused.astype(jnp.float32)


# --------------------- tcnn-style hash-grid encoding (plain JAX glue) ---------
def hash_encode(x, tables):
    """x: (N,3) in [0,1]; tables: (L, T, F). Spatial-hash + trilinear interp."""
    # TODO(synk): tcnn switches to dense (non-hashed) indexing for coarse levels
    # where (res+1)^3 <= hashmap size; here every level is hashed.
    # TODO(synk): longer-term, fuse this gather into the Pallas kernel (tables
    # are only 512 KB and fit VMEM), removing the (N,32) HBM round trip.
    L, T, F = tables.shape
    primes = np.array([1, 2654435761, 805459861], dtype=np.uint32)
    feats = []
    for l in range(L):
        res = int(np.floor(BASE_RESOLUTION * (PER_LEVEL_SCALE ** l)))
        xs = x * res
        x0f = jnp.floor(xs)
        w = xs - x0f
        x0 = x0f.astype(jnp.int32)
        acc = jnp.zeros((x.shape[0], F), jnp.float32)
        for corner in range(8):
            offs = np.array([(corner >> d) & 1 for d in range(3)], dtype=np.int32)
            c = (x0 + offs[None, :]).astype(jnp.uint32)
            idx = (c[:, 0] * jnp.uint32(primes[0])
                   ^ c[:, 1] * jnp.uint32(primes[1])
                   ^ c[:, 2] * jnp.uint32(primes[2]))
            idx = (idx % jnp.uint32(T)).astype(jnp.int32)
            wc = jnp.prod(jnp.where(offs[None, :] == 1, w, 1.0 - w),
                          axis=-1, keepdims=True)
            acc = acc + wc * tables[l][idx]
        feats.append(acc)
    return jnp.concatenate(feats, axis=-1)   # (N, L*F), level-major like tcnn


# ------------------------------- SDF forward ----------------------------------
def sdf_forward(pts, params, with_fea=True):
    # baseImplicitRep.setup(center=0, scale=1): xyz_min = -1, xyz_max = +1
    xyz_min = -jnp.ones((3,), jnp.float32)
    xyz_max = jnp.ones((3,), jnp.float32)
    # TODO(synk): contract_type not defined in the shown code; assumed AABB
    # contraction: normalize into [0,1] and clip.
    pts_c = jnp.clip((pts - xyz_min) / (xyz_max - xyz_min), 0.0, 1.0)

    # Pad ONCE, before the encoder, so feat comes out tile-aligned and no
    # extra full-array copy passes are needed downstream.
    N = pts.shape[0]
    Np = N + (-N % TM)
    pts_cp = jnp.pad(pts_c, ((0, Np - N), (0, 0)))

    feat = hash_encode(pts_cp, params["tables"])           # (Np, 32)

    # progressive mask: mask[:level * n_features_per_level] = 1
    mask = (jnp.arange(ENC_DIM) < CURRENT_LEVEL * N_FEATURES_PER_LEVEL
            ).astype(jnp.float32)
    # TODO(synk): progressive_mask() body not provided; assumed feature * mask
    # (folded into the first-layer weights below — mathematically identical).
    w1_fused, b1_fused = fuse_first_layer(params["w1"], params["b1"], mask)

    # single lane-dense bf16 input slab: [pts | feat | zero pad] -> (Np, 64)
    xin = jnp.concatenate(
        [pts_cp.astype(jnp.bfloat16),
         feat.astype(jnp.bfloat16),
         jnp.zeros((Np, K_IN - 3 - ENC_DIM), jnp.bfloat16)], axis=-1)

    out = run_network(xin,
                      (w1_fused, b1_fused,
                       params["w2"].astype(jnp.bfloat16), params["b2"]),
                      N)
    result = {"sigma": out[:, 0]}
    if with_fea:
        result["fea"] = out
    # TODO(synk): with_grad path (autograd of sdf wrt pts -> normals) not ported.
    return result


# ------------------------------- parameter init --------------------------------
def init_params(key):
    k1, k2, k3 = jax.random.split(key, 3)
    d_in = ENC_DIM + 3 * int(INCLUDE_XYZS)               # 35
    # baseImplicitRep.setup() re-initializes every nn.Linear weight ~ N(0, 0.05),
    # biases stay 0 (sphere_init=False, weight_norm=False here).
    w1 = jax.random.normal(k1, (d_in, N_NEURONS), jnp.float32) * 0.05
    b1 = jnp.zeros((1, N_NEURONS), jnp.float32)
    w2 = jax.random.normal(k2, (N_NEURONS, FEATURE_DIM), jnp.float32) * 0.05
    b2 = jnp.zeros((1, FEATURE_DIM), jnp.float32)
    T = 2 ** LOG2_HASHMAP_SIZE
    tables = jax.random.uniform(k3, (N_LEVELS, T, N_FEATURES_PER_LEVEL),
                                jnp.float32, minval=-1e-4, maxval=1e-4)
    return {"w1": w1, "b1": b1, "w2": w2, "b2": b2, "tables": tables}


if __name__ == "__main__":
    key = jax.random.PRNGKey(0)
    kp, kx = jax.random.split(key)
    params = init_params(kp)
    pts = jax.random.uniform(kx, (256, 3), jnp.float32, minval=-1.0, maxval=1.0)

    result = sdf_forward(pts, params, with_fea=True)
    jax.block_until_ready(result["fea"])

    assert result["sigma"].shape == (256,)
    assert result["fea"].shape == (256, FEATURE_DIM)
    assert bool(jnp.all(jnp.isfinite(result["fea"])))
    print("KERNEL_OK")
</pallas_src>

<mosaic_0001>
module attributes {stable_mosaic.version = 11 : i64} {
  func.func @sdf_mlp_kernel(%arg0: i32, %arg1: memref<512x64xbf16, #tpu.memory_space<vmem>>, %arg2: memref<64x64xbf16, #tpu.memory_space<vmem>>, %arg3: memref<1x64xf32, #tpu.memory_space<vmem>>, %arg4: memref<64x16xbf16, #tpu.memory_space<vmem>>, %arg5: memref<1x16xf32, #tpu.memory_space<vmem>>, %arg6: memref<512x16xf32, #tpu.memory_space<vmem>>) attributes {dimension_semantics = [#tpu.dimension_semantics<parallel>], iteration_bounds = array<i64: 1>, scalar_prefetch = 0 : i64, scratch_operands = 0 : i64, tpu.core_type = #tpu.core_type<tc>, window_params = [{transform_indices = @transform_0, window_bounds = array<i64: 512, 64>}, {pipeline_mode = #tpu.pipeline_mode<synchronous>, transform_indices = @transform_1, window_bounds = array<i64: 64, 64>}, {pipeline_mode = #tpu.pipeline_mode<synchronous>, transform_indices = @transform_2, window_bounds = array<i64: 1, 64>}, {pipeline_mode = #tpu.pipeline_mode<synchronous>, transform_indices = @transform_3, window_bounds = array<i64: 64, 16>}, {pipeline_mode = #tpu.pipeline_mode<synchronous>, transform_indices = @transform_4, window_bounds = array<i64: 1, 16>}, {transform_indices = @transform_5, window_bounds = array<i64: 512, 16>}]} {
    %c0 = arith.constant 0 : index
    %c0_0 = arith.constant 0 : index
    %0 = vector.load %arg1[%c0, %c0_0] : memref<512x64xbf16, #tpu.memory_space<vmem>>, vector<512x64xbf16>
    %c0_1 = arith.constant 0 : index
    %c0_2 = arith.constant 0 : index
    %1 = vector.load %arg2[%c0_1, %c0_2] : memref<64x64xbf16, #tpu.memory_space<vmem>>, vector<64x64xbf16>
    %cst = arith.constant dense<0.000000e+00> : vector<512x64xf32>
    %2 = tpu.matmul %0, %1, %cst {dimension_numbers = #tpu.dot_dimension_numbers<[1], [0], [0], [1], [0, 0, 1, 1], [], []>} : vector<512x64xbf16>, vector<64x64xbf16>, vector<512x64xf32> -> vector<512x64xf32>
    %c0_3 = arith.constant 0 : index
    %c0_4 = arith.constant 0 : index
    %3 = vector.load %arg3[%c0_3, %c0_4] : memref<1x64xf32, #tpu.memory_space<vmem>>, vector<1x64xf32>
    %4 = vector.broadcast %3 : vector<1x64xf32> to vector<512x64xf32>
    %5 = arith.addf %2, %4 : vector<512x64xf32>
    %cst_5 = arith.constant 1.000000e+02 : f32
    %6 = vector.broadcast %cst_5 : f32 to vector<512x64xf32>
    %7 = arith.mulf %5, %6 : vector<512x64xf32>
    %cst_6 = arith.constant 2.000000e+01 : f32
    %8 = vector.broadcast %cst_6 : f32 to vector<512x64xf32>
    %9 = arith.cmpf ogt, %7, %8 : vector<512x64xf32>
    %cst_7 = arith.constant 2.000000e+01 : f32
    %10 = vector.broadcast %cst_7 : f32 to vector<512x64xf32>
    %11 = arith.minimumf %7, %10 : vector<512x64xf32>
    %12 = math.exp %11 : vector<512x64xf32>
    %13 = math.log1p %12 : vector<512x64xf32>
    %cst_8 = arith.constant 1.000000e+02 : f32
    %14 = vector.broadcast %cst_8 : f32 to vector<512x64xf32>
    %15 = arith.divf %13, %14 : vector<512x64xf32>
    %16 = arith.select %9, %5, %15 : vector<512x64xi1>, vector<512x64xf32>
    %17 = arith.truncf %16 : vector<512x64xf32> to vector<512x64xbf16>
    %c0_9 = arith.constant 0 : index
    %c0_10 = arith.constant 0 : index
    %18 = vector.load %arg4[%c0_9, %c0_10] : memref<64x16xbf16, #tpu.memory_space<vmem>>, vector<64x16xbf16>
    %cst_11 = arith.constant dense<0.000000e+00> : vector<512x16xf32>
    %19 = tpu.matmul %17, %18, %cst_11 {dimension_numbers = #tpu.dot_dimension_numbers<[1], [0], [0], [1], [0, 0, 1, 1], [], []>} : vector<512x64xbf16>, vector<64x16xbf16>, vector<512x16xf32> -> vector<512x16xf32>
    %c0_12 = arith.constant 0 : index
    %c0_13 = arith.constant 0 : index
    %20 = vector.load %arg5[%c0_12, %c0_13] : memref<1x16xf32, #tpu.memory_space<vmem>>, vector<1x16xf32>
    %21 = vector.broadcast %20 : vector<1x16xf32> to vector<512x16xf32>
    %22 = arith.addf %19, %21 : vector<512x16xf32>
    %c0_14 = arith.constant 0 : index
    %c0_15 = arith.constant 0 : index
    %23 = vector.load %arg6[%c0_14, %c0_15] : memref<512x16xf32, #tpu.memory_space<vmem>>, vector<512x16xf32>
    tpu.vector_store %arg6[%c0_14, %c0_15], %22 {strides = array<i32>} : memref<512x16xf32, #tpu.memory_space<vmem>>, vector<512x16xf32>,
    return
  }
  func.func @transform_0(%arg0: i32) -> (i32, i32) {
    %c0_i32 = arith.constant 0 : i32
    %c0_i32_0 = arith.constant 0 : i32
    return %arg0, %c0_i32 : i32, i32
  }
  func.func @transform_1(%arg0: i32) -> (i32, i32) {
    %c0_i32 = arith.constant 0 : i32
    %c0_i32_0 = arith.constant 0 : i32
    %c0_i32_1 = arith.constant 0 : i32
    return %c0_i32, %c0_i32_0 : i32, i32
  }
  func.func @transform_2(%arg0: i32) -> (i32, i32) {
    %c0_i32 = arith.constant 0 : i32
    %c0_i32_0 = arith.constant 0 : i32
    %c0_i32_1 = arith.constant 0 : i32
    return %c0_i32, %c0_i32_0 : i32, i32
  }
  func.func @transform_3(%arg0: i32) -> (i32, i32) {
    %c0_i32 = arith.constant 0 : i32
    %c0_i32_0 = arith.constant 0 : i32
    %c0_i32_1 = arith.constant 0 : i32
    return %c0_i32, %c0_i32_0 : i32, i32
  }
  func.func @transform_4(%arg0: i32) -> (i32, i32) {
    %c0_i32 = arith.constant 0 : i32
    %c0_i32_0 = arith.constant 0 : i32
    %c0_i32_1 = arith.constant 0 : i32
    return %c0_i32, %c0_i32_0 : i32, i32
  }
  func.func @transform_5(%arg0: i32) -> (i32, i32) {
    %c0_i32 = arith.constant 0 : i32
    %c0_i32_0 = arith.constant 0 : i32
    return %arg0, %c0_i32 : i32, i32
  }
}

</mosaic_0001>

<bundles_post_ra>
// kernel: tpu_custom_call.1
= control target key start
LH: loop header
LB: loop body
LE: loop exit
PB: predicated region body
PF: predicated region fallthrough
CT: control target
= control target key end

     0   :  { %vm284_vm0 = vcmask 523264   ;;  %s4910_s1 = inlined_call_operand.vmem [shape: bf16[64,64], index: 1, kind: input, shape index: {}]   ;;  %s4911_s0 = inlined_call_operand.vmem [shape: bf16[512,64], index: 0, kind: input, shape index: {}]   ;;  %s4912_s3 = inlined_call_operand.vmem [shape: bf16[64,16], index: 3, kind: input, shape index: {}]   ;;  %s4913_s2 = inlined_call_operand.vmem [shape: f32[1,64], index: 2, kind: input, shape index: {}]   ;;  %s4914_s4 = inlined_call_operand.vmem [shape: f32[1,16], index: 4, kind: input, shape index: {}]   ;;  %s4915_s5 = inlined_call_operand.vmem [shape: f32[512,16], index: 5, kind: output, shape index: {}]  }
   0x1   :  { %v2542_v0 = vld [vmem:[%s4910_s1] sm:$0xff]   ;;  %v2543_v1 = vld [vmem:[%s4910_s1 + $0x8] sm:$0xff]   ;;  %v2544_v2 = vld [vmem:[%s4910_s1 + $0x10] sm:$0xff]  }
   0x2   :  { %2398 = vmatprep.subr.bf16.mxu0 %v2542_v0  ;;  %v2546_v3 = vld [vmem:[%s4911_s0] sm:$0xff]   ;;  %v2545_v4 = vld [vmem:[%s4910_s1 + $0x18] sm:$0xff]   ;;  %v2547_v5 = vld [vmem:[%s4911_s0 + $0x8] sm:$0xff]  }
   0x3   :  { %2399 = vmatpush3.bf16.msra.mxu0 %v2542_v0  ;;  %2406 = vmatprep.mubr.msk.bf16.mxu0 %vm284_vm0, %v2546_v3  ;;  %v2548_v6 = vld [vmem:[%s4911_s0 + $0x10] sm:$0xff]   ;;  %v2549_v7 = vld [vmem:[%s4911_s0 + $0x18] sm:$0xff]   ;;  %v2550_v8 = vld [vmem:[%s4911_s0 + $0x20] sm:$0xff]  }
   0x4   :  { %2400 = vmatprep.subr.bf16.mxu0 %v2543_v1  ;;  %v2551_v9 = vld [vmem:[%s4911_s0 + $0x28] sm:$0xff]   ;;  %v2552_v10 = vld [vmem:[%s4911_s0 + $0x30] sm:$0xff]   ;;  %v2553_v11 = vld [vmem:[%s4911_s0 + $0x38] sm:$0xff]  }
   0x5   :  { %v2554_v12 = vld [vmem:[%s4911_s0 + $0x40] sm:$0xff]   ;;  %v2555_v13 = vld [vmem:[%s4911_s0 + $0x48] sm:$0xff]   ;;  %v2556_v14 = vld [vmem:[%s4911_s0 + $0x50] sm:$0xff]  }
   0x6   :  { %v2557_v15 = vld [vmem:[%s4911_s0 + $0x58] sm:$0xff]   ;;  %v2558_v16 = vld [vmem:[%s4911_s0 + $0x60] sm:$0xff]   ;;  %v2559_v17 = vld [vmem:[%s4911_s0 + $0x68] sm:$0xff]  }
   0x7   :  { %2401 = vmatpush3.bf16.msra.mxu0 %v2543_v1  ;;  %v2560_v18 = vld [vmem:[%s4911_s0 + $0x70] sm:$0xff]   ;;  %v2561_v19 = vld [vmem:[%s4911_s0 + $0x78] sm:$0xff]   ;;  %v2562_v20 = vld [vmem:[%s4911_s0 + $0x80] sm:$0xff]  }
   0x8   :  { %2402 = vmatprep.subr.bf16.mxu0 %v2544_v2  ;;  %v2563_v21 = vld [vmem:[%s4911_s0 + $0x88] sm:$0xff]   ;;  %v2564_v22 = vld [vmem:[%s4911_s0 + $0x90] sm:$0xff]   ;;  %v2565_v23 = vld [vmem:[%s4911_s0 + $0x98] sm:$0xff]  }
   0x9   :  { %v2566_v24 = vld [vmem:[%s4911_s0 + $0xa0] sm:$0xff]   ;;  %v2567_v25 = vld [vmem:[%s4911_s0 + $0xa8] sm:$0xff]   ;;  %v2568_v26 = vld [vmem:[%s4911_s0 + $0xb0] sm:$0xff]  }
   0xa   :  { %v2569_v27 = vld [vmem:[%s4911_s0 + $0xb8] sm:$0xff]   ;;  %v2570_v28 = vld [vmem:[%s4911_s0 + $0xc0] sm:$0xff]   ;;  %v2571_v29 = vld [vmem:[%s4911_s0 + $0xc8] sm:$0xff]  }
   0xb   :  { %2403 = vmatpush3.bf16.msra.mxu0 %v2544_v2  ;;  %v2572_v30 = vld [vmem:[%s4911_s0 + $0xd0] sm:$0xff]   ;;  %v2573_v31 = vld [vmem:[%s4911_s0 + $0xd8] sm:$0xff]   ;;  %v2574_v32 = vld [vmem:[%s4911_s0 + $0xe0] sm:$0xff]  }
   0xc   :  { %2404 = vmatprep.subr.bf16.mxu0 %v2545_v4  ;;  %v2575_v33 = vld [vmem:[%s4911_s0 + $0xe8] sm:$0xff]   ;;  %v2576_v34 = vld [vmem:[%s4911_s0 + $0xf0] sm:$0xff]   ;;  %v2577_v35 = vld [vmem:[%s4911_s0 + $0xf8] sm:$0xff]  }
   0xd   :  { %v2578_v36 = vld [vmem:[%s4912_s3] sm:$0xff]   ;;  %v2579_v37 = vld [vmem:[%s4912_s3 + $0x8] sm:$0xff]   ;;  %v2580_v38 = vld [vmem:[%s4912_s3 + $0x10] sm:$0xff]  }
   0xe   :  { %2470 = vmatprep.subr.bf16.mxu1 %v2578_v36  ;;  %v2581_v39 = vld [vmem:[%s4912_s3 + $0x18] sm:$0xff]   ;;  %v3025_v40 = vld [vmem:[%s4913_s2] ss:$0 sm:$0xff] }
   0xf   :  { %2405 = vmatpush3.bf16.msra.mxu0 %v2545_v4  ;;  %2471 = vmatpush3.bf16.msra.mxu1 %v2578_v36 }
  0x10   :  { %2472 = vmatprep.subr.bf16.mxu1 %v2579_v37 }
  0x12   :  { %2407 = vmatmul.mubr.msk.bf16.vlgmr.msra.gmra.mrb[0].mxu0 %vm284_vm0, %v2547_v5 }
  0x13   :  { %2410 = vmatprep.mubr.msk.bf16.mxu0 %vm284_vm0, %v2548_v6  ;;  %2473 = vmatpush3.bf16.msra.mxu1 %v2579_v37 }
  0x14   :  { %2474 = vmatprep.subr.bf16.mxu1 %v2580_v38 }
  0x17   :  { %2475 = vmatpush3.bf16.msra.mxu1 %v2580_v38 }
  0x18   :  { %2476 = vmatprep.subr.bf16.mxu1 %v2581_v39 }
  0x1a   :  { %2411 = vmatmul.mubr.msk.bf16.gmra.mrb[4].mxu0 %vm284_vm0, %v2549_v7 }
  0x1b   :  { %2414 = vmatprep.mubr.msk.bf16.mxu0 %vm284_vm0, %v2550_v8  ;;  %2477 = vmatpush3.bf16.msra.mxu1 %v2581_v39 }
  0x22   :  { %2415 = vmatmul.mubr.msk.bf16.gmra.mrb[8].mxu0 %vm284_vm0, %v2551_v9 }
  0x23   :  { %2418 = vmatprep.mubr.msk.bf16.mxu0 %vm284_vm0, %v2552_v10 }
  0x2a   :  { %2419 = vmatmul.mubr.msk.bf16.gmra.mrb[12].mxu0 %vm284_vm0, %v2553_v11 }
  0x2b   :  { %2422 = vmatprep.mubr.msk.bf16.mxu0 %vm284_vm0, %v2554_v12 }
  0x32   :  { %2423 = vmatmul.mubr.msk.bf16.gmra.mrb[16].mxu0 %vm284_vm0, %v2555_v13 }
  0x33   :  { %2426 = vmatprep.mubr.msk.bf16.mxu0 %vm284_vm0, %v2556_v14 }
  0x3a   :  { %2427 = vmatmul.mubr.msk.bf16.gmra.mrb[20].mxu0 %vm284_vm0, %v2557_v15 }
  0x3b   :  { %2430 = vmatprep.mubr.msk.bf16.mxu0 %vm284_vm0, %v2558_v16 }
  0x42   :  { %2431 = vmatmul.mubr.msk.bf16.gmra.mrb[24].mxu0 %vm284_vm0, %v2559_v17 }
  0x43   :  { %2434 = vmatprep.mubr.msk.bf16.mxu0 %vm284_vm0, %v2560_v18 }
  0x4a   :  { %2435 = vmatmul.mubr.msk.bf16.gmra.mrb[28].mxu0 %vm284_vm0, %v2561_v19 }
  0x4b   :  { %2438 = vmatprep.mubr.msk.bf16.mxu0 %vm284_vm0, %v2562_v20 }
  0x52   :  { %2439 = vmatmul.mubr.msk.bf16.gmra.mrb[32].mxu0 %vm284_vm0, %v2563_v21 }
  0x53   :  { %2442 = vmatprep.mubr.msk.bf16.mxu0 %vm284_vm0, %v2564_v22 }
  0x5a   :  { %2443 = vmatmul.mubr.msk.bf16.gmra.mrb[36].mxu0 %vm284_vm0, %v2565_v23 }
  0x5b   :  { %2446 = vmatprep.mubr.msk.bf16.mxu0 %vm284_vm0, %v2566_v24 }
  0x62   :  { %2447 = vmatmul.mubr.msk.bf16.gmra.mrb[40].mxu0 %vm284_vm0, %v2567_v25 }
  0x63   :  { %2450 = vmatprep.mubr.msk.bf16.mxu0 %vm284_vm0, %v2568_v26 }
  0x6a   :  { %2451 = vmatmul.mubr.msk.bf16.gmra.mrb[44].mxu0 %vm284_vm0, %v2569_v27 }
  0x6b   :  { %2454 = vmatprep.mubr.msk.bf16.mxu0 %vm284_vm0, %v2570_v28 }
  0x72   :  { %2455 = vmatmul.mubr.msk.bf16.gmra.mrb[48].mxu0 %vm284_vm0, %v2571_v29 }
  0x73   :  { %2458 = vmatprep.mubr.msk.bf16.mxu0 %vm284_vm0, %v2572_v30 }
  0x7a   :  { %2459 = vmatmul.mubr.msk.bf16.gmra.mrb[52].mxu0 %vm284_vm0, %v2573_v31 }
  0x7b   :  { %2462 = vmatprep.mubr.msk.bf16.mxu0 %vm284_vm0, %v2574_v32 }
  0x82   :  { %2463 = vmatmul.mubr.msk.bf16.gmra.mrb[56].mxu0 %vm284_vm0, %v2575_v33 }
  0x83   :  { %2466 = vmatprep.mubr.msk.bf16.mxu0 %vm284_vm0, %v2576_v34 }
  0x8a   :  { %2467 = vmatmul.mubr.msk.bf16.gmra.mrb[60].mxu0 %vm284_vm0, %v2577_v35 }
  0xe5   :  { %v2408_v41 = vpop.f32.mrb[0].mxu0 }
  0xe6   :  { %v3028_v42 = vadd.f32 %v2408_v41, %v3025_v40  ;;  %v415_v43 = vpop.f32.mrb[1].mxu0 }
  0xe7   :  { %v2409_v44 = vpop.f32.mrb[2].mxu0  ;;  %v3048_v58 = vadd.f32 %v3025_v40, %v415_v43 }
  0xe8   :  { %v3031_v45 = vmul.f32 100.0, %v3028_v42  ;;  %v3034_v46 = vadd.f32 %v2409_v44, %v3025_v40  ;;  %v418_v47 = vpop.f32.mrb[3].mxu0 }
  0xe9   :  { %v3071_v4 = vmul.f32 100.0, %v3048_v58  ;;  %v3089_v22 = vadd.f32 %v3025_v40, %v418_v47 }
  0xea   :  { %v800_v48 = vmin.f32 %v3031_v45, 20.0  ;;  %v3038_v49 = vmul.f32 100.0, %v3034_v46  ;;  %vm736_vm2 = vcmp.gt.f32.partialorder %v3031_v45, 20.0 }
  0xeb   :  { %v798_v17 = vmin.f32 %v3071_v4, 20.0  ;;  %v3099_v31 = vmul.f32 100.0, %v3089_v22 }
  0xec   :  { %v866_v50 = vmul.f32 1.442695, %v800_v48  ;;  %v801_v51 = vmin.f32 %v3038_v49, 20.0  ;;  %vm737_vm3 = vcmp.gt.f32.partialorder %v3038_v49, 20.0 }
  0xed   :  { %v2412_v52 = vpop.f32.mrb[4].mxu0  ;;  %v862_v29 = vmul.f32 1.442695, %v798_v17 }
  0xee   :  { %2582 = vpow2.f32 %v866_v50  ;;  %v868_v53 = vmul.f32 1.442695, %v801_v51  ;;  %v3042_v54 = vadd.f32 %v2412_v52, %v3025_v40  ;;  %v431_v55 = vpop.f32.mrb[5].mxu0  ;;  %v799_v51 = vmin.f32 %v3099_v31, 20.0 }
  0xef   :  { %v3045_v56 = vadd.f32 %v3025_v40, %v431_v55  ;;  %v2413_v57 = vpop.f32.mrb[6].mxu0 }
  0xf0   :  { %2584 = vpow2.f32 %v868_v53  ;;  %v3051_v59 = vmul.f32 100.0, %v3042_v54  ;;  %v3054_v60 = vadd.f32 %v2413_v57, %v3025_v40  ;;  %v434_v61 = vpop.f32.mrb[7].mxu0 }
  0xf1   :  { %v3057_v62 = vmul.f32 100.0, %v3045_v56  ;;  %v3060_v63 = vadd.f32 %v3025_v40, %v434_v61 }
  0xf2   :  { %v804_v0 = vmin.f32 %v3051_v59, 20.0  ;;  %v3064_v1 = vmul.f32 100.0, %v3054_v60  ;;  %vm740_vm7 = vcmp.gt.f32.partialorder %v3051_v59, 20.0 }
  0xf3   :  { %v802_v2 = vmin.f32 %v3057_v62, 20.0  ;;  %v3068_v3 = vmul.f32 100.0, %v3060_v63  ;;  %vm738_vm10 = vcmp.gt.f32.partialorder %v3057_v62, 20.0 }
  0xf4   :  { %v874_v5 = vmul.f32 1.442695, %v804_v0  ;;  %v805_v6 = vmin.f32 %v3064_v1, 20.0  ;;  %vm741_vm8 = vcmp.gt.f32.partialorder %v3064_v1, 20.0 }
  0xf5   :  { %v870_v7 = vmul.f32 1.442695, %v802_v2  ;;  %v803_v8 = vmin.f32 %v3068_v3, 20.0  ;;  %v2416_v9 = vpop.f32.mrb[8].mxu0  ;;  %vm739_vm11 = vcmp.gt.f32.partialorder %v3068_v3, 20.0 }
  0xf6   :  { %2586 = vpow2.f32 %v874_v5  ;;  %v876_v10 = vmul.f32 1.442695, %v805_v6  ;;  %v3076_v11 = vadd.f32 %v2416_v9, %v3025_v40  ;;  %v447_v12 = vpop.f32.mrb[9].mxu0 }
  0xf7   :  { %2588 = vpow2.f32 %v870_v7  ;;  %v872_v13 = vmul.f32 1.442695, %v803_v8  ;;  %v3079_v14 = vadd.f32 %v3025_v40, %v447_v12  ;;  %v2417_v15 = vpop.f32.mrb[10].mxu0 }
  0xf8   :  { %v2583_v16 = vpop.eup %2582  ;;  %2590 = vpow2.f32 %v876_v10  ;;  %v3083_v18 = vmul.f32 100.0, %v3076_v11  ;;  %v3086_v19 = vadd.f32 %v2417_v15, %v3025_v40  ;;  %v450_v20 = vpop.f32.mrb[11].mxu0 }
  0xf9   :  { %v1008_v21 = vadd.f32 1.0, %v2583_v16  ;;  %2592 = vpow2.f32 %v872_v13  ;;  %v3093_v25 = vmul.f32 100.0, %v3079_v14  ;;  %v1011_v28 = vmul.f32 -0.5, %v2583_v16 }
  0xfa   :  { %v2585_v23 = vpop.eup %2584  ;;  %v808_v24 = vmin.f32 %v3083_v18, 20.0  ;;  %v3096_v26 = vmul.f32 100.0, %v3086_v19  ;;  %v1014_v34 = vand.u32 2147483647, %v2583_v16  ;;  %v3122_v9 = vadd.f32 %v3025_v40, %v450_v20 }
  0xfb   :  { %2594 = vlog2.f32 %v1008_v21  ;;  %v1017_v27 = vadd.f32 1.0, %v2585_v23  ;;  %v806_v32 = vmin.f32 %v3093_v25, 20.0  ;;  %v1020_v35 = vmul.f32 -0.5, %v2585_v23 }
  0xfc   :  { %v882_v30 = vmul.f32 1.442695, %v808_v24  ;;  %v809_v36 = vmin.f32 %v3096_v26, 20.0  ;;  %v1012_v43 = vadd.f32 1.0, %v1011_v28  ;;  %v1023_v44 = vand.u32 2147483647, %v2585_v23 }
  0xfd   :  { %2596 = vlog2.f32 %v1017_v27  ;;  %v2420_v33 = vpop.f32.mrb[12].mxu0  ;;  %v878_v38 = vmul.f32 1.442695, %v806_v32  ;;  %vm3108_vm1 = vcmp.lt.f32.partialorder %v1014_v34, 0.0004427343  ;;  %v1021_v57 = vadd.f32 1.0, %v1020_v35 }
  0xfe   :  { %2598 = vpow2.f32 %v882_v30  ;;  %v463_v37 = vpop.f32.mrb[13].mxu0  ;;  %v884_v47 = vmul.f32 1.442695, %v809_v36  ;;  %v1013_v7 = vmul.f32 %v2583_v16, %v1012_v43  ;;  %vm3117_vm4 = vcmp.lt.f32.partialorder %v1023_v44, 0.0004427343 }
  0xff   :  { %v2421_v39 = vpop.f32.mrb[14].mxu0  ;;  %2600 = vpow2.f32 %v862_v29  ;;  %v3126_v15 = vadd.f32 %v2420_v33, %v3025_v40  ;;  %v3132_v27 = vadd.f32 %v3025_v40, %v463_v37  ;;  %v1022_v29 = vmul.f32 %v2585_v23, %v1021_v57 }
 0x100   :  { %v2587_v41 = vpop.eup %2586  ;;  %v3103_v48 = vpop.f32.mrb[15].mxu0  ;;  %2602 = vpow2.f32 %v878_v38  ;;  %vm744_vm15 = vcmp.gt.f32.partialorder %v3083_v18, 20.0 }
 0x101   :  { %v2589_v50 = vpop.eup %2588  ;;  %v1044_v52 = vadd.f32 1.0, %v2587_v41  ;;  %2604 = vpow2.f32 %v884_v47  ;;  %v1047_v2 = vmul.f32 -0.5, %v2587_v41  ;;  %v1050_v12 = vand.u32 2147483647, %v2587_v41 }
 0x102   :  { %v3106_v53 = vpop.eup %2590  ;;  %v1026_v61 = vadd.f32 1.0, %v2589_v50  ;;  %v1029_v5 = vmul.f32 -0.5, %v2589_v50  ;;  %v1032_v21 = vand.u32 2147483647, %v2589_v50 }
 0x103   :  { %v3112_v0 = vpop.eup %2592  ;;  %2606 = vlog2.f32 %v1044_v52  ;;  %v1053_v6 = vadd.f32 1.0, %v3106_v53  ;;  %v1056_v24 = vmul.f32 -0.5, %v3106_v53  ;;  %v1048_v30 = vadd.f32 1.0, %v1047_v2 }
 0x104   :  { %2608 = vlog2.f32 %v1026_v61  ;;  %v1035_v13 = vadd.f32 1.0, %v3112_v0  ;;  %v1030_v32 = vadd.f32 1.0, %v1029_v5  ;;  %v1059_v38 = vand.u32 2147483647, %v3106_v53 }
 0x105   :  { %v2595_v10 = vpop.eup %2594  ;;  %2610 = vlog2.f32 %v1053_v6  ;;  %v3128_v17 = vpop.f32.mrb[16].mxu0  ;;  %v1038_v43 = vmul.f32 -0.5, %v3112_v0  ;;  %vm3144_vm5 = vcmp.lt.f32.partialorder %v1050_v12, 0.0004427343  ;;  %v3149_v52 = vadd.f32 %v2421_v39, %v3025_v40 }
 0x106   :  { %v1010_v16 = vmul.f32 0.6931472, %v2595_v10  ;;  %v3134_v28 = vpop.f32.mrb[17].mxu0  ;;  %2612 = vlog2.f32 %v1035_v13  ;;  %vm3155_vm6 = vcmp.lt.f32.partialorder %v1032_v21, 0.0004427343  ;;  %v1057_v2 = vadd.f32 1.0, %v1056_v24 }
 0x107   :  { %v2597_v20 = vpop.eup %2596  ;;  %v3136_v34 = vpop.f32.mrb[18].mxu0  ;;  %v1049_v10 = vmul.f32 %v2587_v41, %v1048_v30  ;;  %v1041_v12 = vand.u32 2147483647, %v3112_v0  ;;  %v1031_v13 = vmul.f32 %v2589_v50, %v1030_v32  ;;  %vm3166_vm9 = vcmp.lt.f32.partialorder %v1059_v38, 0.0004427343 }
 0x108   :  { %v2599_v33 = vpop.eup %2598  ;;  %v1016_v35 = vsel %vm3108_vm1, %v1013_v7, %v1010_v16  ;;  %v1019_v36 = vmul.f32 0.6931472, %v2597_v20  ;;  %v3142_v37 = vpop.f32.mrb[19].mxu0  ;;  %v1039_v16 = vadd.f32 1.0, %v1038_v43  ;;  %v3171_v21 = vmul.f32 100.0, %v3122_v9 }
 0x109   :  { %v1569_v44 = vmul.f32 0.01, %v1016_v35  ;;  %v1080_v23 = vadd.f32 1.0, %v2599_v33  ;;  %v3151_v57 = vpop.eup %2600  ;;  %v1083_v5 = vmul.f32 -0.5, %v2599_v33  ;;  %v1086_v20 = vand.u32 2147483647, %v2599_v33 }
 0x10a   :  { %v1025_v55 = vsel %vm3117_vm4, %v1022_v29, %v1019_v36  ;;  %v3159_v6 = vpop.eup %2602  ;;  %vm3193_vm12 = vcmp.lt.f32.partialorder %v1041_v12, 0.0004427343  ;;  %vm745_vm1 = vcmp.gt.f32.partialorder %v3096_v26, 20.0  ;;  %v3294_v18 = vadd.f32 %v3136_v34, %v3025_v40 }
 0x10b   :  { %v1570_v7 = vmul.f32 0.01, %v1025_v55  ;;  %2614 = vlog2.f32 %v1080_v23  ;;  %v3162_v39 = vpop.eup %2604  ;;  %v3176_v41 = vsel %vm736_vm2, %v3028_v42, %v1569_v44  ;;  %v1058_v42 = vmul.f32 %v3106_v53, %v1057_v2 }
 0x10c   :  { %4934 = vst [vmem:[#allocation2_spill] sm:$0xff] %v3176_v41  ;;  %v1089_v29 = vadd.f32 1.0, %v3162_v39  ;;  %v1084_v45 = vadd.f32 1.0, %v1083_v5  ;;  %v1062_v44 = vadd.f32 1.0, %v3159_v6  ;;  %v1040_v2 = vmul.f32 %v3112_v0, %v1039_v16 }
 0x10d   :  { %v2607_v24 = vpop.eup %2606  ;;  %v3181_v50 = vsel %vm737_vm3, %v3034_v46, %v1570_v7  ;;  %v3184_v30 = vpop.f32.mrb[20].mxu0  ;;  %v1092_v5 = vmul.f32 -0.5, %v3162_v39  ;;  %vm3208_vm13 = vcmp.lt.f32.partialorder %v1086_v20, 0.0004427343  ;;  %v3221_v20 = vmul.f32 100.0, %v3132_v27 }
 0x10e   :  { %v2609_v32 = vpop.eup %2608  ;;  %v1046_v36 = vmul.f32 0.6931472, %v2607_v24  ;;  %v3191_v49 = vpop.f32.mrb[21].mxu0  ;;  %2616 = vlog2.f32 %v1089_v29  ;;  %v807_v29 = vmin.f32 %v3171_v21, 20.0  ;;  %v1085_v16 = vmul.f32 %v2599_v33, %v1084_v45 }
 0x10f   :  { %v2611_v46 = vpop.eup %2610  ;;  %v1028_v38 = vmul.f32 0.6931472, %v2609_v32  ;;  %v3198_v23 = vpop.f32.mrb[22].mxu0  ;;  %2618 = vlog2.f32 %v1062_v44  ;;  %v810_v1 = vmin.f32 %v3221_v20, 20.0  ;;  %v1068_v34 = vand.u32 2147483647, %v3159_v6 }
 0x110   :  { %v1052_v55 = vsel %vm3144_vm5, %v1049_v10, %v1046_v36  ;;  %v1055_v53 = vmul.f32 0.6931472, %v2611_v46  ;;  %v3204_v7 = vpop.f32.mrb[23].mxu0  ;;  %v2613_v24 = vpop.eup %2612  ;;  %v880_v46 = vmul.f32 1.442695, %v807_v29  ;;  %vm742_vm3 = vcmp.gt.f32.partialorder %v3093_v25, 20.0 }
 0x111   :  { %v1573_v12 = vmul.f32 0.01, %v1052_v55  ;;  %v1034_v32 = vsel %vm3155_vm6, %v1031_v13, %v1028_v38  ;;  %v1037_v0 = vmul.f32 0.6931472, %v2613_v24  ;;  %v3216_v55 = vmul.f32 100.0, %v3126_v15 }
 0x112   :  { %v1571_v47 = vmul.f32 0.01, %v1034_v32  ;;  %v1061_v10 = vsel %vm3166_vm9, %v1058_v42, %v1055_v53  ;;  %v1093_v13 = vadd.f32 1.0, %v1092_v5  ;;  %v3224_v38 = vmul.f32 100.0, %v3149_v52 }
 0x113   :  { %v1574_v36 = vmul.f32 0.01, %v1061_v10  ;;  %v1043_v61 = vsel %vm3193_vm12, %v1040_v2, %v1037_v0  ;;  %v3229_v33 = vsel %vm740_vm7, %v3042_v54, %v1573_v12  ;;  %2620 = vpow2.f32 %v880_v46 }
 0x114   :  { %4939 = vst [vmem:[#allocation3_spill] sm:$0xff] %v3229_v33  ;;  %v1572_v45 = vmul.f32 0.01, %v1043_v61  ;;  %v1095_v2 = vand.u32 2147483647, %v3162_v39  ;;  %v812_v5 = vmin.f32 %v3216_v55, 20.0  ;;  %v3247_v54 = vsel %vm738_vm10, %v3045_v56, %v1571_v47 }
 0x115   :  { %v2615_v8 = vpop.eup %2614  ;;  %v3234_v42 = vsel %vm741_vm8, %v3054_v60, %v1574_v36  ;;  %v3236_v43 = vpop.f32.mrb[24].mxu0  ;;  %4941 = vst [vmem:[#allocation5_spill] sm:$0xff] %v3247_v54  ;;  %v813_v24 = vmin.f32 %v3224_v38, 20.0  ;;  %v3264_v56 = vadd.f32 %v3025_v40, %v3103_v48  ;;  %v1065_v47 = vmul.f32 -0.5, %v3159_v6 }
 0x116   :  { %4940 = vst [vmem:[#allocation4_spill] sm:$0xff] %v3234_v42  ;;  %v1082_v53 = vmul.f32 0.6931472, %v2615_v8  ;;  %v3242_v59 = vpop.f32.mrb[25].mxu0  ;;  %v3252_v60 = vsel %vm739_vm11, %v3060_v63, %v1572_v45  ;;  %v890_v62 = vmul.f32 1.442695, %v812_v5  ;;  %v1094_v10 = vmul.f32 %v3162_v39, %v1093_v13 }
 0x117   :  { %4942 = vst [vmem:[#allocation6_spill] sm:$0xff] %v3252_v60  ;;  %v3256_v12 = vpop.f32.mrb[26].mxu0  ;;  %v886_v0 = vmul.f32 1.442695, %v810_v1  ;;  %v3272_v36 = vadd.f32 %v3128_v17, %v3025_v40  ;;  %v892_v35 = vmul.f32 1.442695, %v813_v24  ;;  %v3290_v1 = vadd.f32 %v3025_v40, %v3134_v28 }
 0x118   :  { %v1088_v29 = vsel %vm3208_vm13, %v1085_v16, %v1082_v53  ;;  %v3266_v3 = vpop.f32.mrb[27].mxu0  ;;  %v2617_v63 = vpop.eup %2616  ;;  %2622 = vpow2.f32 %v890_v62  ;;  %v3275_v16 = vmul.f32 100.0, %v3264_v56  ;;  %vm1096_vm14 = vcmp.lt.f32.partialorder %v1095_v2, 0.0004427343 }
 0x119   :  { %v1091_v46 = vmul.f32 0.6931472, %v2617_v63  ;;  %v1577_v48 = vmul.f32 0.01, %v1088_v29  ;;  %2624 = vpow2.f32 %v886_v0  ;;  %v3278_v61 = vmul.f32 100.0, %v3272_v36  ;;  %v2619_v17 = vpop.eup %2618 }
 0x11a   :  { %v864_v39 = vmul.f32 1.442695, %v799_v51  ;;  %2626 = vpow2.f32 %v892_v35  ;;  %v811_v45 = vmin.f32 %v3275_v16, 20.0  ;;  %v1066_v5 = vadd.f32 1.0, %v1065_v47 }
 0x11b   :  { %v1097_v13 = vsel %vm1096_vm14, %v1094_v10, %v1091_v46  ;;  %v816_v53 = vmin.f32 %v3278_v61, 20.0  ;;  %v3298_v51 = vadd.f32 %v3025_v40, %v3142_v37  ;;  %v3303_v29 = vsel %vm744_vm15, %v3076_v11, %v1577_v48 }
 0x11c   :  { %v1578_v8 = vmul.f32 0.01, %v1097_v13  ;;  %4943 = vst [vmem:[#allocation7_spill] sm:$0xff] %v3303_v29  ;;  %v888_v63 = vmul.f32 1.442695, %v811_v45  ;;  %v3316_v11 = vmul.f32 100.0, %v3290_v1  ;;  %v1067_v13 = vmul.f32 %v3159_v6, %v1066_v5 }
 0x11d   :  { %v3286_v2 = vpop.f32.mrb[28].mxu0  ;;  %v2621_v24 = vpop.eup %2620  ;;  %v898_v28 = vmul.f32 1.442695, %v816_v53  ;;  %v1064_v10 = vmul.f32 0.6931472, %v2619_v17  ;;  %v3322_v35 = vmul.f32 100.0, %v3298_v51  ;;  %v3384_v54 = vadd.f32 %v3025_v40, %v3191_v49 }
 0x11e   :  { %v3300_v26 = vpop.f32.mrb[29].mxu0  ;;  %v3306_v62 = vsel %vm745_vm1, %v3086_v19, %v1578_v8  ;;  %v1071_v0 = vadd.f32 1.0, %v2621_v24  ;;  %2628 = vpow2.f32 %v888_v63  ;;  %v3319_v19 = vmul.f32 100.0, %v3294_v18 }
 0x11f   :  { %4944 = vst [vmem:[#allocation8_spill] sm:$0xff] %v3306_v62  ;;  %v3308_v47 = vpop.f32.mrb[30].mxu0  ;;  %v1074_v48 = vmul.f32 -0.5, %v2621_v24  ;;  %v814_v17 = vmin.f32 %v3316_v11, 20.0  ;;  %v3328_v8 = vadd.f32 %v3184_v30, %v3025_v40  ;;  %vm3332_vm2 = vcmp.lt.f32.partialorder %v1068_v34, 0.0004427343 }
 0x120   :  { %4945 = vst [vmem:[#allocation9_spill] sm:$0xff] %v3308_v47  ;;  %v3313_v46 = vpop.f32.mrb[31].mxu0  ;;  %2630 = vlog2.f32 %v1071_v0  ;;  %v817_v63 = vmin.f32 %v3319_v19, 20.0  ;;  %v1070_v6 = vsel %vm3332_vm2, %v1067_v13, %v1064_v10  ;;  %v1077_v44 = vand.u32 2147483647, %v2621_v24 }
 0x121   :  { %4946 = vst [vmem:[#allocation10_spill] sm:$0xff] %v3313_v46  ;;  %2632 = vpow2.f32 %v898_v28  ;;  %4947 = vst [vmem:[#allocation11_spill] sm:$0xff] %v3328_v8  ;;  %v815_v28 = vmin.f32 %v3322_v35, 20.0  ;;  %v1075_v0 = vadd.f32 1.0, %v1074_v48  ;;  %v894_v32 = vmul.f32 1.442695, %v814_v17 }
 0x122   :  { %v3330_v45 = vpop.eup %2622  ;;  %2634 = vpow2.f32 %v864_v39  ;;  %v900_v62 = vmul.f32 1.442695, %v817_v63  ;;  %v3348_v39 = vmul.f32 100.0, %v3328_v8  ;;  %v3357_v17 = vadd.f32 1.0, %v3151_v57 }
 0x123   :  { %v3337_v37 = vpop.eup %2624  ;;  %v1116_v5 = vadd.f32 1.0, %v3330_v45  ;;  %v1119_v48 = vmul.f32 -0.5, %v3330_v45  ;;  %v896_v13 = vmul.f32 1.442695, %v815_v28  ;;  %v1575_v63 = vmul.f32 0.01, %v1070_v6 }
 0x124   :  { %v3343_v30 = vpop.eup %2626  ;;  %v1098_v34 = vadd.f32 1.0, %v3337_v37  ;;  %vm743_vm4 = vcmp.gt.f32.partialorder %v3171_v21, 20.0  ;;  %vm3362_vm5 = vcmp.lt.f32.partialorder %v1077_v44, 0.0004427343  ;;  %v1076_v42 = vmul.f32 %v2621_v24, %v1075_v0 }
 0x125   :  { %2636 = vlog2.f32 %v1116_v5  ;;  %v1125_v29 = vadd.f32 1.0, %v3343_v30  ;;  %v3350_v53 = vpop.f32.mrb[32].mxu0  ;;  %v820_v28 = vmin.f32 %v3348_v39, 20.0  ;;  %v1122_v6 = vand.u32 2147483647, %v3330_v45 }
 0x126   :  { %4950 = vst [vmem:[#allocation12_spill] sm:$0xff] %v3350_v53  ;;  %2638 = vlog2.f32 %v1098_v34  ;;  %v3353_v10 = vpop.f32.mrb[33].mxu0  ;;  %v1104_v44 = vand.u32 2147483647, %v3337_v37  ;;  %v1120_v46 = vadd.f32 1.0, %v1119_v48  ;;  %vm748_vm6 = vcmp.gt.f32.partialorder %v3216_v55, 20.0 }
 0x127   :  { %4951 = vst [vmem:[#allocation13_spill] sm:$0xff] %v3353_v10  ;;  %2640 = vlog2.f32 %v1125_v29  ;;  %v3359_v5 = vpop.f32.mrb[34].mxu0  ;;  %v1128_v29 = vmul.f32 -0.5, %v3343_v30  ;;  %v906_v24 = vmul.f32 1.442695, %v820_v28  ;;  %vm749_vm7 = vcmp.gt.f32.partialorder %v3224_v38, 20.0 }
 0x128   :  { %4952 = vst [vmem:[#allocation14_spill] sm:$0xff] %v3359_v5  ;;  %2642 = vpow2.f32 %v894_v32  ;;  %v3366_v34 = vpop.f32.mrb[35].mxu0  ;;  %v3368_v10 = vpop.eup %2628  ;;  %v1101_v5 = vmul.f32 -0.5, %v3337_v37  ;;  %vm3406_vm8 = vcmp.lt.f32.partialorder %v1122_v6, 0.0004427343  ;;  %vm746_vm12 = vcmp.gt.f32.partialorder %v3221_v20, 20.0 }
 0x129   :  { %4955 = vst [vmem:[#allocation15_spill] sm:$0xff] %v3366_v34  ;;  %2644 = vpow2.f32 %v900_v62  ;;  %v1107_v53 = vadd.f32 1.0, %v3368_v10  ;;  %v1131_v62 = vand.u32 2147483647, %v3343_v30  ;;  %v1129_v48 = vadd.f32 1.0, %v1128_v29 }
 0x12a   :  { %v2631_v8 = vpop.eup %2630  ;;  %2646 = vpow2.f32 %v896_v13  ;;  %v1110_v13 = vmul.f32 -0.5, %v3368_v10  ;;  %v1102_v25 = vadd.f32 1.0, %v1101_v5  ;;  %vm3410_vm9 = vcmp.lt.f32.partialorder %v1104_v44, 0.0004427343 }
 0x12b   :  { %v3376_v32 = vpop.eup %2632  ;;  %v1073_v34 = vmul.f32 0.6931472, %v2631_v8  ;;  %2648 = vlog2.f32 %v1107_v53  ;;  %v3398_v53 = vsel %vm742_vm3, %v3079_v14, %v1575_v63  ;;  %vm3419_vm10 = vcmp.lt.f32.partialorder %v1131_v62, 0.0004427343 }
 0x12c   :  { %v1152_v47 = vadd.f32 1.0, %v3376_v32  ;;  %v3388_v41 = vpop.eup %2634  ;;  %2650 = vpow2.f32 %v906_v24  ;;  %v1130_v44 = vmul.f32 %v3343_v30, %v1129_v48  ;;  %vm747_vm13 = vcmp.gt.f32.partialorder %v3275_v16, 20.0 }
 0x12d   :  { %v3378_v0 = vpop.f32.mrb[36].mxu0  ;;  %v1079_v8 = vsel %vm3362_vm5, %v1076_v42, %v1073_v34  ;;  %v1121_v34 = vmul.f32 %v3330_v45, %v1120_v46  ;;  %v3424_v46 = vmul.f32 100.0, %v3384_v54  ;;  %v1158_v30 = vand.u32 2147483647, %v3376_v32 }
 0x12e   :  { %4956 = vst [vmem:[#allocation16_spill] sm:$0xff] %v3378_v0  ;;  %v3386_v60 = vpop.f32.mrb[37].mxu0  ;;  %v1576_v49 = vmul.f32 0.01, %v1079_v8  ;;  %2652 = vlog2.f32 %v1152_v47  ;;  %vm752_vm15 = vcmp.gt.f32.partialorder %v3278_v61, 20.0  ;;  %vm753_vm2 = vcmp.gt.f32.partialorder %v3319_v19, 20.0 }
 0x12f   :  { %4957 = vst [vmem:[#allocation17_spill] sm:$0xff] %v3386_v60  ;;  %v3393_v28 = vpop.f32.mrb[38].mxu0  ;;  %v1113_v60 = vand.u32 2147483647, %v3368_v10  ;;  %v2637_v42 = vpop.eup %2636  ;;  %v818_v29 = vmin.f32 %v3424_v46, 20.0  ;;  %2654 = vlog2.f32 %v3357_v17  ;;  %v3464_v17 = vadd.f32 %v3025_v40, %v3204_v7 }
 0x130   :  { %4958 = vst [vmem:[#allocation18_spill] sm:$0xff] %v3393_v28  ;;  %v3403_v33 = vpop.f32.mrb[39].mxu0  ;;  %v2639_v63 = vpop.eup %2638  ;;  %v3417_v24 = vsel %vm743_vm4, %v3122_v9, %v1576_v49  ;;  %v1118_v47 = vmul.f32 0.6931472, %v2637_v42  ;;  %v1155_v49 = vmul.f32 -0.5, %v3376_v32  ;;  %vm750_vm4 = vcmp.gt.f32.partialorder %v3316_v11, 20.0 }
 0x131   :  { %4959 = vst [vmem:[#allocation19_spill] sm:$0xff] %v3403_v33  ;;  %v2641_v45 = vpop.eup %2640  ;;  %v1100_v6 = vmul.f32 0.6931472, %v2639_v63  ;;  %v1111_v33 = vadd.f32 1.0, %v1110_v13  ;;  %vm3431_vm11 = vcmp.lt.f32.partialorder %v1113_v60, 0.0004427343  ;;  %v1103_v63 = vmul.f32 %v3337_v37, %v1102_v25 }
 0x132   :  { %v2643_v28 = vpop.eup %2642  ;;  %v1124_v9 = vsel %vm3406_vm8, %v1121_v34, %v1118_v47  ;;  %v1127_v21 = vmul.f32 0.6931472, %v2641_v45  ;;  %vm3507_vm14 = vcmp.lt.f32.partialorder %v1158_v30, 0.0004427343  ;;  %v996_v20 = vand.u32 2147483647, %v3151_v57 }
 0x133   :  { %v3436_v42 = vpop.eup %2644  ;;  %v1581_v0 = vmul.f32 0.01, %v1124_v9  ;;  %v1134_v48 = vadd.f32 1.0, %v2643_v28  ;;  %v1106_v37 = vsel %vm3410_vm9, %v1103_v63, %v1100_v6  ;;  %v1137_v9 = vmul.f32 -0.5, %v2643_v28 }
 0x134   :  { %v1133_v60 = vsel %vm3419_vm10, %v1130_v44, %v1127_v21  ;;  %v1161_v34 = vadd.f32 1.0, %v3436_v42  ;;  %v3451_v45 = vpop.eup %2646  ;;  %v1112_v44 = vmul.f32 %v3368_v10, %v1111_v33  ;;  %v3460_v21 = vadd.f32 %v3198_v23, %v3025_v40 }
 0x135   :  { %v3442_v13 = vpop.f32.mrb[40].mxu0  ;;  %v1582_v25 = vmul.f32 0.01, %v1133_v60  ;;  %2656 = vlog2.f32 %v1134_v48  ;;  %v2649_v8 = vpop.eup %2648  ;;  %v3473_v6 = vsel %vm748_vm6, %v3126_v15, %v1581_v0  ;;  %v1164_v33 = vmul.f32 -0.5, %v3436_v42 }
 0x136   :  { %v3449_v47 = vpop.f32.mrb[41].mxu0  ;;  %2658 = vlog2.f32 %v1161_v34  ;;  %v3468_v14 = vpop.eup %2650  ;;  %v1109_v23 = vmul.f32 0.6931472, %v2649_v8  ;;  %v1579_v7 = vmul.f32 0.01, %v1106_v37  ;;  %v1156_v60 = vadd.f32 1.0, %v1155_v49 }
 0x137   :  { %4968 = vst [vmem:[#allocation20_spill] sm:$0xff] %v3449_v47  ;;  %v3455_v5 = vpop.f32.mrb[42].mxu0  ;;  %v3478_v10 = vsel %vm749_vm7, %v3149_v52, %v1582_v25  ;;  %v1143_v34 = vadd.f32 1.0, %v3451_v45  ;;  %v1138_v55 = vadd.f32 1.0, %v1137_v9  ;;  %v1140_v0 = vand.u32 2147483647, %v2643_v28 }
 0x138   :  { %4969 = vst [vmem:[#allocation21_spill] sm:$0xff] %v3455_v5  ;;  %v3466_v47 = vpop.f32.mrb[43].mxu0  ;;  %v2653_v63 = vpop.eup %2652  ;;  %v1115_v15 = vsel %vm3431_vm11, %v1112_v44, %v1109_v23  ;;  %v1167_v52 = vand.u32 2147483647, %v3436_v42  ;;  %v3488_v25 = vmul.f32 100.0, %v3460_v21  ;;  %v1165_v8 = vadd.f32 1.0, %v1164_v33 }
 0x139   :  { %4970 = vst [vmem:[#allocation22_spill] sm:$0xff] %v3466_v47  ;;  %v902_v47 = vmul.f32 1.442695, %v818_v29  ;;  %v1580_v38 = vmul.f32 0.01, %v1115_v15  ;;  %2660 = vlog2.f32 %v1143_v34  ;;  %v1188_v48 = vadd.f32 1.0, %v3468_v14 }
 0x13a   :  { %v1154_v37 = vmul.f32 0.6931472, %v2653_v63  ;;  %v3492_v49 = vmul.f32 100.0, %v3464_v17  ;;  %v3499_v62 = vsel %vm746_vm12, %v3132_v27, %v1579_v7  ;;  %v1157_v9 = vmul.f32 %v3376_v32, %v1156_v60  ;;  %v2655_v32 = vpop.eup %2654 }
 0x13b   :  { %v3504_v29 = vsel %vm747_vm13, %v3264_v56, %v1580_v38  ;;  %v1139_v27 = vmul.f32 %v2643_v28, %v1138_v55  ;;  %vm3516_vm1 = vcmp.lt.f32.partialorder %v1140_v0, 0.0004427343  ;;  %v1146_v56 = vmul.f32 -0.5, %v3451_v45 }
 0x13c   :  { %vm3524_vm3 = vcmp.lt.f32.partialorder %v1167_v52, 0.0004427343  ;;  %v1149_v63 = vand.u32 2147483647, %v3451_v45  ;;  %2662 = vpow2.f32 %v902_v47  ;;  %v821_v28 = vmin.f32 %v3488_v25, 20.0 }
 0x13d   :  { %v3494_v5 = vpop.f32.mrb[44].mxu0  ;;  %v1160_v34 = vsel %vm3507_vm14, %v1157_v9, %v1154_v37  ;;  %v1166_v15 = vmul.f32 %v3436_v42, %v1165_v8  ;;  %2664 = vlog2.f32 %v1188_v48  ;;  %v819_v55 = vmin.f32 %v3492_v49, 20.0 }
 0x13e   :  { %v3511_v23 = vpop.f32.mrb[45].mxu0  ;;  %v908_v52 = vmul.f32 1.442695, %v821_v28  ;;  %v993_v47 = vmul.f32 -0.5, %v3151_v57  ;;  %v999_v33 = vadd.f32 1.0, %v3388_v41  ;;  %v3541_v37 = vadd.f32 %v3236_v43, %v3025_v40 }
 0x13f   :  { %4973 = vst [vmem:[#allocation23_spill] sm:$0xff] %v3511_v23  ;;  %v3522_v16 = vpop.f32.mrb[46].mxu0  ;;  %v2657_v60 = vpop.eup %2656  ;;  %v904_v23 = vmul.f32 1.442695, %v819_v55  ;;  %v1585_v42 = vmul.f32 0.01, %v1160_v34 }
 0x140   :  { %4976 = vst [vmem:[#allocation24_spill] sm:$0xff] %v3522_v16  ;;  %v3530_v7 = vpop.f32.mrb[47].mxu0  ;;  %v2659_v0 = vpop.eup %2658  ;;  %v1136_v38 = vmul.f32 0.6931472, %v2657_v60  ;;  %vm3545_vm5 = vcmp.lt.f32.partialorder %v1149_v63, 0.0004427343  ;;  %2666 = vpow2.f32 %v908_v52 }
 0x141   :  { %4979 = vst [vmem:[#allocation25_spill] sm:$0xff] %v3530_v7  ;;  %v1163_v16 = vmul.f32 0.6931472, %v2659_v0  ;;  %v1147_v7 = vadd.f32 1.0, %v1146_v56  ;;  %2668 = vpow2.f32 %v904_v23  ;;  %v992_v44 = vmul.f32 0.6931472, %v2655_v32 }
 0x142   :  { %v1142_v48 = vsel %vm3516_vm1, %v1139_v27, %v1136_v38  ;;  %v994_v56 = vadd.f32 1.0, %v993_v47  ;;  %v1191_v34 = vmul.f32 -0.5, %v3468_v14  ;;  %2670 = vlog2.f32 %v999_v33 }
 0x143   :  { %v1169_v9 = vsel %vm3524_vm3, %v1166_v15, %v1163_v16  ;;  %v2661_v60 = vpop.eup %2660  ;;  %v1583_v63 = vmul.f32 0.01, %v1142_v48  ;;  %v1148_v0 = vmul.f32 %v3451_v45, %v1147_v7  ;;  %v3559_v16 = vmul.f32 100.0, %v3541_v37 }
 0x144   :  { %v1586_v43 = vmul.f32 0.01, %v1169_v9  ;;  %v1145_v55 = vmul.f32 0.6931472, %v2661_v60  ;;  %v3566_v32 = vsel %vm752_vm15, %v3272_v36, %v1585_v42  ;;  %v1194_v30 = vand.u32 2147483647, %v3468_v14 }
 0x145   :  { %v3551_v28 = vpop.f32.mrb[48].mxu0  ;;  %v3576_v45 = vadd.f32 %v3025_v40, %v3242_v59  ;;  %v995_v61 = vmul.f32 %v3151_v57, %v994_v56  ;;  %v1002_v19 = vmul.f32 -0.5, %v3388_v41  ;;  %vm751_vm6 = vcmp.gt.f32.partialorder %v3322_v35, 20.0 }
 0x146   :  { %4982 = vst [vmem:[#allocation26_spill] sm:$0xff] %v3551_v28  ;;  %v3555_v27 = vpop.f32.mrb[49].mxu0  ;;  %v3571_v33 = vsel %vm753_vm2, %v3294_v18, %v1586_v43  ;;  %v1151_v36 = vsel %vm3545_vm5, %v1148_v0, %v1145_v55  ;;  %v3586_v18 = vpop.eup %2662  ;;  %vm3589_vm7 = vcmp.lt.f32.partialorder %v996_v20, 0.0004427343  ;;  %v824_v52 = vmin.f32 %v3559_v16, 20.0 }
 0x147   :  { %4983 = vst [vmem:[#allocation27_spill] sm:$0xff] %v3555_v27  ;;  %v3561_v23 = vpop.f32.mrb[50].mxu0  ;;  %v1584_v38 = vmul.f32 0.01, %v1151_v36  ;;  %v2665_v47 = vpop.eup %2664  ;;  %v3597_v42 = vsel %vm750_vm4, %v3290_v1, %v1583_v63  ;;  %v1192_v57 = vadd.f32 1.0, %v1191_v34  ;;  %v1170_v48 = vadd.f32 1.0, %v3586_v18 }
 0x148   :  { %4984 = vst [vmem:[#allocation28_spill] sm:$0xff] %v3561_v23  ;;  %v3578_v7 = vpop.f32.mrb[51].mxu0  ;;  %v998_v8 = vsel %vm3589_vm7, %v995_v61, %v992_v44  ;;  %v1005_v9 = vand.u32 2147483647, %v3388_v41  ;;  %v914_v56 = vmul.f32 1.442695, %v824_v52 }
 0x149   :  { %4985 = vst [vmem:[#allocation29_spill] sm:$0xff] %v3578_v7  ;;  %v3603_v35 = vsel %vm751_vm6, %v3298_v51, %v1584_v38  ;;  %v3607_v60 = vmul.f32 100.0, %v3576_v45  ;;  %vm734_vm8 = vcmp.gt.f32.partialorder %v3071_v4, 20.0  ;;  %2672 = vlog2.f32 %v1170_v48 }
 0x14a   :  { %v1003_v11 = vadd.f32 1.0, %v1002_v19  ;;  %v3614_v34 = vpop.eup %2666  ;;  %v1190_v44 = vmul.f32 0.6931472, %v2665_v47  ;;  %v1567_v51 = vmul.f32 0.01, %v998_v8  ;;  %2674 = vpow2.f32 %v914_v56 }
 0x14b   :  { %v822_v20 = vmin.f32 %v3607_v60, 20.0  ;;  %v3619_v55 = vpop.eup %2668  ;;  %vm735_vm9 = vcmp.gt.f32.partialorder %v3099_v31, 20.0  ;;  %v1193_v0 = vmul.f32 %v3468_v14, %v1192_v57  ;;  %vm3623_vm10 = vcmp.lt.f32.partialorder %v1194_v30, 0.0004427343 }
 0x14c   :  { %v1197_v61 = vadd.f32 1.0, %v3614_v34  ;;  %v2671_v38 = vpop.eup %2670  ;;  %v1173_v59 = vmul.f32 -0.5, %v3586_v18  ;;  %v1176_v52 = vand.u32 2147483647, %v3586_v18  ;;  %v1179_v47 = vadd.f32 1.0, %v3619_v55 }
 0x14d   :  { %v3612_v43 = vpop.f32.mrb[52].mxu0  ;;  %vm1006_vm11 = vcmp.lt.f32.partialorder %v1005_v9, 0.0004427343  ;;  %v1001_v48 = vmul.f32 0.6931472, %v2671_v38  ;;  %v1004_v14 = vmul.f32 %v3388_v41, %v1003_v11  ;;  %v1196_v8 = vsel %vm3623_vm10, %v1193_v0, %v1190_v44 }
 0x14e   :  { %4988 = vst [vmem:[#allocation30_spill] sm:$0xff] %v3612_v43  ;;  %v3617_v63 = vpop.f32.mrb[53].mxu0  ;;  %2676 = vlog2.f32 %v1197_v61  ;;  %v910_v30 = vmul.f32 1.442695, %v822_v20  ;;  %v1200_v56 = vmul.f32 -0.5, %v3614_v34  ;;  %v1631_v15 = vsel %vm734_vm8, %v3048_v58, %v1567_v51  ;;  %v5030_v43 = vld [vmem:[#allocation14_spill] sm:$0xff] }
 0x14f   :  { %4989 = vst [vmem:[#allocation31_spill] sm:$0xff] %v3617_v63  ;;  %v3628_v19 = vpop.f32.mrb[54].mxu0  ;;  %2678 = vlog2.f32 %v1179_v47  ;;  %v1182_v1 = vmul.f32 -0.5, %v3619_v55  ;;  %v1007_v9 = vsel %vm1006_vm11, %v1004_v14, %v1001_v48  ;;  %v3645_v41 = vadd.f32 %v3256_v12, %v3025_v40 }
 0x150   :  { %4992 = vst [vmem:[#allocation32_spill] sm:$0xff] %v3628_v19  ;;  %v3634_v57 = vpop.f32.mrb[55].mxu0  ;;  %2680 = vpow2.f32 %v910_v30  ;;  %v1174_v11 = vadd.f32 1.0, %v1173_v59  ;;  %v1568_v20 = vmul.f32 0.01, %v1007_v9  ;;  %v3649_v44 = vadd.f32 %v3025_v40, %v3266_v3 }
 0x151   :  { %4993 = vst [vmem:[#allocation33_spill] sm:$0xff] %v3634_v57  ;;  %v3653_v0 = vadd.f32 %v3286_v2, %v3025_v40  ;;  %v1203_v58 = vand.u32 2147483647, %v3614_v34  ;;  %v1185_v4 = vand.u32 2147483647, %v3619_v55  ;;  %v3658_v51 = vmul.f32 100.0, %v3645_v41 }
 0x152   :  { %v3662_v12 = vadd.f32 %v3025_v40, %v3300_v26  ;;  %v1201_v61 = vadd.f32 1.0, %v1200_v56  ;;  %v1632_v3 = vsel %vm735_vm9, %v3089_v22, %v1568_v20  ;;  %v3670_v2 = vmul.f32 100.0, %v3649_v44  ;;  %v5012_v57 = vld [vmem:[#allocation11_spill] sm:$0xff] }
 0x153   :  { %v3673_v38 = vmul.f32 100.0, %v3653_v0  ;;  %v2673_v47 = vpop.eup %2672  ;;  %vm756_vm12 = vcmp.gt.f32.partialorder %v3348_v39, 20.0  ;;  %v1589_v40 = vmul.f32 0.01, %v1196_v8  ;;  %v1183_v26 = vadd.f32 1.0, %v1182_v1 }
 0x154   :  { %v1695_v48 = vpack.c.bf16 %v1632_v3, %v1631_v15  ;;  %v825_v14 = vmin.f32 %v3658_v51, 20.0  ;;  %v3681_v31 = vpop.eup %2674  ;;  %v1172_v22 = vmul.f32 0.6931472, %v2673_v47  ;;  %vm3683_vm13 = vcmp.lt.f32.partialorder %v1176_v52, 0.0004427343 }
 0x155   :  { %v3664_v36 = vpop.f32.mrb[56].mxu0  ;;  %vm757_vm14 = vcmp.gt.f32.partialorder %v3488_v25, 20.0  ;;  %v823_v9 = vmin.f32 %v3670_v2, 20.0  ;;  %v3690_v20 = vmul.f32 100.0, %v3662_v12  ;;  %vm754_vm15 = vcmp.gt.f32.partialorder %v3424_v46, 20.0  ;;  %v5014_v25 = vld [vmem:[#allocation3_spill] sm:$0xff] }
 0x156   :  { %4994 = vst [vmem:[#allocation34_spill] sm:$0xff] %v3664_v36  ;;  %v3675_v59 = vpop.f32.mrb[57].mxu0  ;;  %v1175_v15 = vmul.f32 %v3586_v18, %v1174_v11  ;;  %vm3694_vm1 = vcmp.lt.f32.partialorder %v1203_v58, 0.0004427343  ;;  %2478 = vmatprep.mubr.msk.bf16.mxu1 %vm284_vm0, %v1695_v48  ;;  %v1224_v52 = vadd.f32 1.0, %v3681_v31  ;;  %v1202_v3 = vmul.f32 %v3614_v34, %v1201_v61  ;;  %v5005_v34 = vld [vmem:[#allocation6_spill] sm:$0xff] }
 0x157   :  { %4995 = vst [vmem:[#allocation35_spill] sm:$0xff] %v3675_v59  ;;  %v3679_v30 = vpop.f32.mrb[58].mxu0  ;;  %v916_v8 = vmul.f32 1.442695, %v825_v14  ;;  %vm3701_vm2 = vcmp.lt.f32.partialorder %v1185_v4, 0.0004427343  ;;  %v1184_v14 = vmul.f32 %v3619_v55, %v1183_v26 }
 0x158   :  { %4996 = vst [vmem:[#allocation36_spill] sm:$0xff] %v3679_v30  ;;  %v5003_v30 = vld [vmem:[#allocation2_spill] sm:$0xff]  ;;  %v912_v18 = vmul.f32 1.442695, %v823_v9  ;;  %v828_v11 = vmin.f32 %v3673_v38, 20.0  ;;  %v2677_v58 = vpop.eup %2676  ;;  %v1178_v48 = vsel %vm3683_vm13, %v1175_v15, %v1172_v22  ;;  %2682 = vlog2.f32 %v1224_v52  ;;  %v5006_v4 = vld [vmem:[#allocation5_spill] sm:$0xff] }
 0x159   :  { %v5004_v59 = vpack.c.bf16 %v3181_v50, %v5003_v30  ;;  %v5007_v61 = vpack.c.bf16 %v5005_v34, %v5006_v4  ;;  %v3720_v50 = vld [vmem:[%s4913_s2] ss:$0 sm:$0xff]  ;;  %v2679_v9 = vpop.eup %2678  ;;  %v1199_v56 = vmul.f32 0.6931472, %v2677_v58  ;;  %2684 = vpow2.f32 %v916_v8  ;;  %v3727_v26 = vpop.f32.mrb[59].mxu0 }
 0x15a   :  { %v922_v22 = vmul.f32 1.442695, %v828_v11  ;;  %v826_v55 = vmin.f32 %v3690_v20, 20.0  ;;  %5009 = vst [vmem:[#allocation2_spill] sm:$0xff] %v3727_v26  ;;  %v3729_v15 = vpop.eup %2680  ;;  %v1181_v52 = vmul.f32 0.6931472, %v2679_v9  ;;  %2686 = vpow2.f32 %v912_v18 }
 0x15b   :  { %2479 = vmatmul.mubr.msk.bf16.vlgmr.msra.gmra.mrb[0].mxu1 %vm284_vm0, %v5004_v59  ;;  %v5008_v59 = vld [vmem:[#allocation9_spill] sm:$0xff]  ;;  %v1227_v34 = vmul.f32 -0.5, %v3681_v31  ;;  %v5010_v4 = vld [vmem:[#allocation10_spill] sm:$0xff]  ;;  %v1205_v58 = vsel %vm3694_vm1, %v1202_v3, %v1199_v56  ;;  %v1206_v8 = vadd.f32 1.0, %v3729_v15  ;;  %v5011_v11 = vld [vmem:[#allocation12_spill] sm:$0xff]  ;;  %vm755_vm3 = vcmp.gt.f32.partialorder %v3492_v49, 20.0 }
 0x15c   :  { %2482 = vmatprep.mubr.msk.bf16.mxu1 %vm284_vm0, %v5007_v61  ;;  %v3724_v30 = vadd.f32 %v3720_v50, %v5008_v59  ;;  %v3734_v61 = vadd.f32 %v3720_v50, %v5010_v4  ;;  %v1587_v59 = vmul.f32 0.01, %v1178_v48  ;;  %v3741_v36 = vadd.f32 %v3720_v50, %v5011_v11  ;;  %v5024_v56 = vld [vmem:[#allocation8_spill] sm:$0xff] }
 0x15d   :  { %v1590_v26 = vmul.f32 0.01, %v1205_v58  ;;  %v1187_v9 = vsel %vm3701_vm2, %v1184_v14, %v1181_v52  ;;  %2688 = vpow2.f32 %v922_v22  ;;  %v918_v18 = vmul.f32 1.442695, %v826_v55 }
 0x15e   :  { %v3748_v4 = vsel %vm756_vm12, %v5012_v57, %v1589_v40  ;;  %v1588_v1 = vmul.f32 0.01, %v1187_v9  ;;  %2690 = vlog2.f32 %v1206_v8  ;;  %v1228_v48 = vadd.f32 1.0, %v1227_v34  ;;  %v5013_v40 = vld [vmem:[#allocation4_spill] sm:$0xff] }
 0x15f   :  { %v3754_v3 = vsel %vm757_vm14, %v3460_v21, %v1590_v26  ;;  %2692 = vpow2.f32 %v918_v18  ;;  %v3757_v47 = vmul.f32 100.0, %v3724_v30  ;;  %v3762_v39 = vsel %vm754_vm15, %v3384_v54, %v1587_v59  ;;  %v3788_v26 = vpop.f32.mrb[60].mxu0 }
 0x160   :  { %v3767_v57 = vsel %vm755_vm3, %v3464_v17, %v1588_v1  ;;  %v5015_v21 = vpack.c.bf16 %v5013_v40, %v5014_v25  ;;  %v3774_v14 = vmul.f32 100.0, %v3734_v61  ;;  %v1209_v54 = vmul.f32 -0.5, %v3729_v15  ;;  %5017 = vst [vmem:[#allocation6_spill] sm:$0xff] %v3788_v26  ;;  %v3791_v58 = vpop.f32.mrb[61].mxu0  ;;  %v5027_v25 = vld [vmem:[#allocation13_spill] sm:$0xff] }
 0x161   :  { %v829_v46 = vmin.f32 %v3757_v47, 20.0  ;;  %v5016_v22 = vpack.c.bf16 %v3417_v24, %v3398_v53  ;;  %v3785_v17 = vmul.f32 100.0, %v3741_v36  ;;  %v1230_v55 = vand.u32 2147483647, %v3681_v31  ;;  %5018 = vst [vmem:[#allocation5_spill] sm:$0xff] %v3791_v58  ;;  %v5025_v58 = vld [vmem:[#allocation7_spill] sm:$0xff] }
 0x162   :  { %v2683_v52 = vpop.eup %2682  ;;  %v1212_v34 = vand.u32 2147483647, %v3729_v15  ;;  %v1229_v9 = vmul.f32 %v3681_v31, %v1228_v48  ;;  %v827_v53 = vmin.f32 %v3774_v14, 20.0  ;;  %v1210_v18 = vadd.f32 1.0, %v1209_v54 }
 0x163   :  { %2483 = vmatmul.mubr.msk.bf16.gmra.mrb[4].mxu1 %vm284_vm0, %v5015_v21  ;;  %v924_v59 = vmul.f32 1.442695, %v829_v46  ;;  %v2685_v8 = vpop.eup %2684  ;;  %v1226_v11 = vmul.f32 0.6931472, %v2683_v52  ;;  %v832_v40 = vmin.f32 %v3785_v17, 20.0  ;;  %vm760_vm4 = vcmp.gt.f32.partialorder %v3559_v16, 20.0 }
 0x164   :  { %2486 = vmatprep.mubr.msk.bf16.mxu1 %vm284_vm0, %v5016_v22  ;;  %v2687_v24 = vpop.eup %2686  ;;  %v1233_v1 = vadd.f32 1.0, %v2685_v8  ;;  %vm3797_vm5 = vcmp.lt.f32.partialorder %v1230_v55, 0.0004427343  ;;  %v1236_v21 = vmul.f32 -0.5, %v2685_v8  ;;  %vm3805_vm6 = vcmp.lt.f32.partialorder %v1212_v34, 0.0004427343 }
 0x165   :  { %2694 = vpow2.f32 %v924_v59  ;;  %v1215_v46 = vadd.f32 1.0, %v2687_v24  ;;  %v1232_v31 = vsel %vm3797_vm5, %v1229_v9, %v1226_v11  ;;  %v1218_v54 = vmul.f32 -0.5, %v2687_v24  ;;  %v3809_v52 = vpop.f32.mrb[62].mxu0 }
 0x166   :  { %2696 = vlog2.f32 %v1233_v1  ;;  %5023 = vst [vmem:[#allocation9_spill] sm:$0xff] %v3809_v52  ;;  %v920_v49 = vmul.f32 1.442695, %v827_v53  ;;  %v5026_v26 = vpack.c.bf16 %v5024_v56, %v5025_v58  ;;  %v3818_v34 = vadd.f32 %v3720_v50, %v5027_v25  ;;  %v3828_v58 = vpop.f32.mrb[63].mxu0 }
 0x167   :  { %v3801_v22 = vpop.eup %2688  ;;  %2698 = vlog2.f32 %v1215_v46  ;;  %v1211_v9 = vmul.f32 %v3729_v15, %v1210_v18  ;;  %v1239_v1 = vand.u32 2147483647, %v2685_v8  ;;  %v1221_v52 = vand.u32 2147483647, %v2687_v24  ;;  %5029 = vst [vmem:[#allocation10_spill] sm:$0xff] %v3828_v58  ;;  %v5031_v18 = vld [vmem:[#allocation15_spill] sm:$0xff] }
 0x168   :  { %v2691_v59 = vpop.eup %2690  ;;  %v1260_v55 = vadd.f32 1.0, %v3801_v22  ;;  %v930_v19 = vmul.f32 1.442695, %v832_v40  ;;  %v5028_v46 = vpack.c.bf16 %v3504_v29, %v3499_v62  ;;  %v1593_v53 = vmul.f32 0.01, %v1232_v31 }
 0x169   :  { %v3820_v11 = vpop.eup %2692  ;;  %v1237_v56 = vadd.f32 1.0, %v1236_v21  ;;  %v1208_v25 = vmul.f32 0.6931472, %v2691_v59  ;;  %v1219_v63 = vadd.f32 1.0, %v1218_v54  ;;  %v3832_v15 = vadd.f32 %v3720_v50, %v5030_v43  ;;  %v5032_v21 = vld [vmem:[#allocation16_spill] sm:$0xff]  ;;  %v5037_v59 = vld [vmem:[#allocation17_spill] sm:$0xff] }
 0x16a   :  { %2700 = vlog2.f32 %v1260_v55  ;;  %v3836_v40 = vadd.f32 %v3720_v50, %v5031_v18  ;;  %v1263_v62 = vmul.f32 -0.5, %v3801_v22  ;;  %v3840_v29 = vmul.f32 100.0, %v3818_v34 }
 0x16b   :  { %2487 = vmatmul.mubr.msk.bf16.gmra.mrb[8].mxu1 %vm284_vm0, %v5026_v26  ;;  %v1242_v26 = vadd.f32 1.0, %v3820_v11  ;;  %v3844_v31 = vadd.f32 %v3720_v50, %v5032_v21  ;;  %vm3846_vm7 = vcmp.lt.f32.partialorder %v1239_v1, 0.0004427343  ;;  %vm3850_vm8 = vcmp.lt.f32.partialorder %v1221_v52, 0.0004427343 }
 0x16c   :  { %2490 = vmatprep.mubr.msk.bf16.mxu1 %vm284_vm0, %v5028_v46  ;;  %v3856_v55 = vadd.f32 %v3720_v50, %v5037_v59  ;;  %v3861_v46 = vsel %vm760_vm4, %v3541_v37, %v1593_v53  ;;  %vm758_vm9 = vcmp.gt.f32.partialorder %v3607_v60, 20.0  ;;  %vm761_vm10 = vcmp.gt.f32.partialorder %v3658_v51, 20.0 }
 0x16d   :  { %2702 = vlog2.f32 %v1242_v26  ;;  %v1238_v1 = vmul.f32 %v2685_v8, %v1237_v56  ;;  %v830_v52 = vmin.f32 %v3840_v29, 20.0  ;;  %vm759_vm11 = vcmp.gt.f32.partialorder %v3670_v2, 20.0 }
 0x16e   :  { %2704 = vpow2.f32 %v920_v49  ;;  %v1214_v49 = vsel %vm3805_vm6, %v1211_v9, %v1208_v25  ;;  %v1220_v18 = vmul.f32 %v2687_v24, %v1219_v63  ;;  %v3872_v16 = vmul.f32 100.0, %v3832_v15 }
 0x16f   :  { %2706 = vpow2.f32 %v930_v19  ;;  %v3866_v26 = vpop.eup %2694  ;;  %v3875_v37 = vmul.f32 100.0, %v3836_v40  ;;  %v1264_v53 = vadd.f32 1.0, %v1263_v62  ;;  %v1266_v8 = vand.u32 2147483647, %v3801_v22 }
 0x170   :  { %v1269_v19 = vadd.f32 1.0, %v3866_v26  ;;  %v926_v56 = vmul.f32 1.442695, %v830_v52  ;;  %v5038_v21 = vpack.c.bf16 %v3478_v10, %v3473_v6  ;;  %v2697_v48 = vpop.eup %2696  ;;  %v1245_v63 = vmul.f32 -0.5, %v3820_v11 }
 0x171   :  { %v1248_v24 = vand.u32 2147483647, %v3820_v11  ;;  %v833_v9 = vmin.f32 %v3872_v16, 20.0  ;;  %v831_v25 = vmin.f32 %v3875_v37, 20.0  ;;  %v5039_v62 = vpack.c.bf16 %v3603_v35, %v3597_v42  ;;  %v2699_v59 = vpop.eup %2698 }
 0x172   :  { %v1591_v52 = vmul.f32 0.01, %v1214_v49  ;;  %v1235_v58 = vmul.f32 0.6931472, %v2697_v48  ;;  %2708 = vlog2.f32 %v1269_v19  ;;  %v3892_v6 = vmul.f32 100.0, %v3844_v31 }
 0x173   :  { %2491 = vmatmul.mubr.msk.bf16.gmra.mrb[12].mxu1 %vm284_vm0, %v5038_v21  ;;  %v1217_v10 = vmul.f32 0.6931472, %v2699_v59  ;;  %2710 = vpow2.f32 %v926_v56  ;;  %v932_v21 = vmul.f32 1.442695, %v833_v9  ;;  %v928_v7 = vmul.f32 1.442695, %v831_v25 }
 0x174   :  { %2494 = vmatprep.mubr.msk.bf16.mxu1 %vm284_vm0, %v5039_v62  ;;  %v2701_v23 = vpop.eup %2700  ;;  %v1241_v27 = vsel %vm3846_vm7, %v1238_v1, %v1235_v58  ;;  %v1265_v28 = vmul.f32 %v3801_v22, %v1264_v53  ;;  %vm3897_vm12 = vcmp.lt.f32.partialorder %v1266_v8, 0.0004427343  ;;  %v1272_v35 = vmul.f32 -0.5, %v3866_v26 }
 0x175   :  { %v1594_v49 = vmul.f32 0.01, %v1241_v27  ;;  %v1223_v19 = vsel %vm3850_vm8, %v1220_v18, %v1217_v10  ;;  %v1246_v48 = vadd.f32 1.0, %v1245_v63  ;;  %2712 = vpow2.f32 %v932_v21  ;;  %v5048_v21 = vld [vmem:[#allocation18_spill] sm:$0xff] }
 0x176   :  { %v1592_v9 = vmul.f32 0.01, %v1223_v19  ;;  %v1262_v25 = vmul.f32 0.6931472, %v2701_v23  ;;  %2714 = vpow2.f32 %v928_v7  ;;  %v836_v58 = vmin.f32 %v3892_v6, 20.0 }
 0x177   :  { %v2703_v56 = vpop.eup %2702  ;;  %v1655_v22 = vsel %vm758_vm9, %v3576_v45, %v1591_v52  ;;  %v3911_v27 = vsel %vm761_vm10, %v3645_v41, %v1594_v49  ;;  %v1275_v1 = vand.u32 2147483647, %v3866_v26  ;;  %v1273_v53 = vadd.f32 1.0, %v1272_v35 }
 0x178   :  { %v2705_v54 = vpop.eup %2704  ;;  %v1244_v43 = vmul.f32 0.6931472, %v2703_v56  ;;  %v1708_v23 = vpack.c.bf16 %v3911_v27, %v3861_v46  ;;  %v1656_v7 = vsel %vm759_vm11, %v3649_v44, %v1592_v9  ;;  %v5042_v45 = vpack.c.bf16 %v3571_v33, %v3566_v32 }
 0x179   :  { %v3914_v18 = vpop.eup %2706  ;;  %v1251_v60 = vadd.f32 1.0, %v2705_v54  ;;  %v1707_v41 = vpack.c.bf16 %v1656_v7, %v1655_v22  ;;  %v1247_v51 = vmul.f32 %v3820_v11, %v1246_v48  ;;  %vm3926_vm13 = vcmp.lt.f32.partialorder %v1248_v24, 0.0004427343 }
 0x17a   :  { %v3931_v63 = vmul.f32 100.0, %v3856_v55  ;;  %v5045_v44 = vpack.c.bf16 %v3767_v57, %v3762_v39  ;;  %v1268_v32 = vsel %vm3897_vm12, %v1265_v28, %v1262_v25  ;;  %v1296_v33 = vadd.f32 1.0, %v3914_v18 }
 0x17b   :  { %2495 = vmatmul.mubr.msk.bf16.gmra.mrb[16].mxu1 %vm284_vm0, %v5042_v45  ;;  %2716 = vlog2.f32 %v1251_v60  ;;  %v938_v2 = vmul.f32 1.442695, %v836_v58  ;;  %vm764_vm14 = vcmp.gt.f32.partialorder %v3673_v38, 20.0  ;;  %v1250_v11 = vsel %vm3926_vm13, %v1247_v51, %v1244_v43 }
 0x17c   :  { %2498 = vmatprep.mubr.msk.bf16.mxu1 %vm284_vm0, %v5045_v44  ;;  %v1254_v24 = vmul.f32 -0.5, %v2705_v54  ;;  %v2709_v62 = vpop.eup %2708  ;;  %vm762_vm15 = vcmp.gt.f32.partialorder %v3690_v20, 20.0  ;;  %v1274_v39 = vmul.f32 %v3866_v26, %v1273_v53  ;;  %vm3945_vm1 = vcmp.lt.f32.partialorder %v1275_v1, 0.0004427343 }
 0x17d   :  { %2718 = vlog2.f32 %v1296_v33  ;;  %v3949_v28 = vpop.eup %2710  ;;  %v1597_v59 = vmul.f32 0.01, %v1268_v32  ;;  %v1271_v52 = vmul.f32 0.6931472, %v2709_v62  ;;  %v834_v10 = vmin.f32 %v3931_v63, 20.0 }
 0x17e   :  { %v3954_v42 = vadd.f32 %v3720_v50, %v5048_v21  ;;  %v1595_v35 = vmul.f32 0.01, %v1250_v11  ;;  %v1257_v49 = vand.u32 2147483647, %v2705_v54  ;;  %v1278_v19 = vadd.f32 1.0, %v3949_v28  ;;  %v5054_v11 = vld [vmem:[#allocation19_spill] sm:$0xff] }
 0x17f   :  { %2720 = vpow2.f32 %v938_v2  ;;  %v3957_v26 = vpop.eup %2712  ;;  %vm765_vm2 = vcmp.gt.f32.partialorder %v3757_v47, 20.0  ;;  %v1277_v48 = vsel %vm3945_vm1, %v1274_v39, %v1271_v52  ;;  %v1255_v56 = vadd.f32 1.0, %v1254_v24  ;;  %v5055_v39 = vld [vmem:[#allocation20_spill] sm:$0xff] }
 0x180   :  { %v1299_v9 = vmul.f32 -0.5, %v3914_v18  ;;  %v3963_v25 = vpop.eup %2714  ;;  %v1598_v58 = vmul.f32 0.01, %v1277_v48  ;;  %v1302_v22 = vand.u32 2147483647, %v3914_v18  ;;  %2722 = vlog2.f32 %v1278_v19 }
 0x181   :  { %v1281_v43 = vmul.f32 -0.5, %v3949_v28  ;;  %v5049_v1 = vpack.c.bf16 %v3754_v3, %v3748_v4  ;;  %vm763_vm3 = vcmp.gt.f32.partialorder %v3774_v14, 20.0  ;;  %v1305_v7 = vadd.f32 1.0, %v3957_v26 }
 0x182   :  { %v1287_v53 = vadd.f32 1.0, %v3963_v25  ;;  %v934_v60 = vmul.f32 1.442695, %v834_v10  ;;  %v3975_v45 = vmul.f32 100.0, %v3954_v42  ;;  %v3981_v51 = vsel %vm764_vm14, %v3653_v0, %v1597_v59 }
 0x183   :  { %2499 = vmatmul.mubr.msk.bf16.gmra.mrb[20].mxu1 %vm284_vm0, %v5049_v1  ;;  %v1659_v4 = vsel %vm762_vm15, %v3662_v12, %v1595_v35  ;;  %v3989_v3 = vsel %vm765_vm2, %v3724_v30, %v1598_v58  ;;  %vm3991_vm4 = vcmp.lt.f32.partialorder %v1257_v49, 0.0004427343  ;;  %v1256_v44 = vmul.f32 %v2705_v54, %v1255_v56 }
 0x184   :  { %2502 = vmatprep.mubr.msk.bf16.mxu1 %vm284_vm0, %v1707_v41  ;;  %v1710_v41 = vpack.c.bf16 %v3989_v3, %v3981_v51  ;;  %v1300_v38 = vadd.f32 1.0, %v1299_v9  ;;  %2724 = vlog2.f32 %v1305_v7  ;;  %vm3997_vm5 = vcmp.lt.f32.partialorder %v1302_v22, 0.0004427343 }
 0x185   :  { %v2717_v0 = vpop.eup %2716  ;;  %v1282_v12 = vadd.f32 1.0, %v1281_v43  ;;  %v1284_v20 = vand.u32 2147483647, %v3949_v28  ;;  %2726 = vlog2.f32 %v1287_v53  ;;  %v1308_v47 = vmul.f32 -0.5, %v3957_v26 }
 0x186   :  { %v1253_v30 = vmul.f32 0.6931472, %v2717_v0  ;;  %2728 = vpow2.f32 %v934_v60  ;;  %v837_v33 = vmin.f32 %v3975_v45, 20.0  ;;  %v1290_v54 = vmul.f32 -0.5, %v3963_v25 }
 0x187   :  { %v2719_v2 = vpop.eup %2718  ;;  %v4007_v24 = vadd.f32 %v3720_v50, %v5054_v11  ;;  %v4011_v62 = vadd.f32 %v3720_v50, %v3442_v13  ;;  %v4015_v57 = vadd.f32 %v3720_v50, %v5055_v39  ;;  %v1301_v10 = vmul.f32 %v3914_v18, %v1300_v38 }
 0x188   :  { %v1259_v59 = vsel %vm3991_vm4, %v1256_v44, %v1253_v30  ;;  %v1298_v52 = vmul.f32 0.6931472, %v2719_v2  ;;  %v940_v21 = vmul.f32 1.442695, %v837_v33  ;;  %v1283_v19 = vmul.f32 %v3949_v28, %v1282_v12 }
 0x189   :  { %v4020_v35 = vpop.eup %2720  ;;  %v1596_v49 = vmul.f32 0.01, %v1259_v59  ;;  %v1311_v48 = vand.u32 2147483647, %v3957_v26  ;;  %v4025_v13 = vmul.f32 100.0, %v4007_v24  ;;  %v1309_v56 = vadd.f32 1.0, %v1308_v47 }
 0x18a   :  { %v1293_v9 = vand.u32 2147483647, %v3963_v25  ;;  %v1332_v18 = vadd.f32 1.0, %v4020_v35  ;;  %v4034_v58 = vmul.f32 100.0, %v4011_v62  ;;  %v2723_v22 = vpop.eup %2722  ;;  %vm768_vm6 = vcmp.gt.f32.partialorder %v3785_v17, 20.0 }
 0x18b   :  { %2503 = vmatmul.mubr.msk.bf16.gmra.mrb[24].mxu1 %vm284_vm0, %v1708_v23  ;;  %v1660_v28 = vsel %vm763_vm3, %v3734_v61, %v1596_v49  ;;  %v1291_v43 = vadd.f32 1.0, %v1290_v54  ;;  %2730 = vpow2.f32 %v940_v21  ;;  %v4041_v46 = vmul.f32 100.0, %v4015_v57  ;;  %v5063_v21 = vld [vmem:[#allocation22_spill] sm:$0xff] }
 0x18c   :  { %v1709_v27 = vpack.c.bf16 %v1660_v28, %v1659_v4  ;;  %v1304_v23 = vsel %vm3997_vm5, %v1301_v10, %v1298_v52  ;;  %vm766_vm7 = vcmp.gt.f32.partialorder %v3840_v29, 20.0  ;;  %v1280_v1 = vmul.f32 0.6931472, %v2723_v22 }
 0x18d   :  { %2732 = vlog2.f32 %v1332_v18  ;;  %vm4046_vm8 = vcmp.lt.f32.partialorder %v1284_v20, 0.0004427343  ;;  %vm769_vm9 = vcmp.gt.f32.partialorder %v3872_v16, 20.0  ;;  %vm4051_vm10 = vcmp.lt.f32.partialorder %v1311_v48, 0.0004427343  ;;  %v5062_v20 = vld [vmem:[#allocation21_spill] sm:$0xff] }
 0x18e   :  { %v835_v14 = vmin.f32 %v4025_v13, 20.0  ;;  %v2725_v53 = vpop.eup %2724  ;;  %v1286_v60 = vsel %vm4046_vm8, %v1283_v19, %v1280_v1  ;;  %v1310_v4 = vmul.f32 %v3957_v26, %v1309_v56  ;;  %vm4059_vm11 = vcmp.lt.f32.partialorder %v1293_v9, 0.0004427343  ;;  %2506 = vmatprep.mubr.msk.bf16.mxu1 %vm284_vm0, %v1709_v27 }
 0x18f   :  { %v840_v44 = vmin.f32 %v4034_v58, 20.0  ;;  %v2727_v38 = vpop.eup %2726  ;;  %v1601_v0 = vmul.f32 0.01, %v1304_v23  ;;  %v1307_v32 = vmul.f32 0.6931472, %v2725_v53  ;;  %v4067_v30 = vadd.f32 %v3720_v50, %v5062_v20  ;;  %v5067_v20 = vld [vmem:[#allocation24_spill] sm:$0xff] }
 0x190   :  { %v936_v12 = vmul.f32 1.442695, %v835_v14  ;;  %v4069_v47 = vpop.eup %2728  ;;  %v1289_v33 = vmul.f32 0.6931472, %v2727_v38  ;;  %v1292_v26 = vmul.f32 %v3963_v25, %v1291_v43  ;;  %v838_v54 = vmin.f32 %v4041_v46, 20.0 }
 0x191   :  { %v946_v2 = vmul.f32 1.442695, %v840_v44  ;;  %v1599_v11 = vmul.f32 0.01, %v1286_v60  ;;  %v1313_v39 = vsel %vm4051_vm10, %v1310_v4, %v1307_v32  ;;  %v1335_v59 = vmul.f32 -0.5, %v4020_v35 }
 0x192   :  { %v1314_v52 = vadd.f32 1.0, %v4069_v47  ;;  %v1602_v10 = vmul.f32 0.01, %v1313_v39  ;;  %v1295_v25 = vsel %vm4059_vm11, %v1292_v26, %v1289_v33  ;;  %2734 = vpow2.f32 %v936_v12 }
 0x193   :  { %2507 = vmatmul.mubr.msk.bf16.gmra.mrb[28].mxu1 %vm284_vm0, %v1710_v41  ;;  %v4085_v49 = vadd.f32 %v3720_v50, %v5063_v21  ;;  %v1600_v19 = vmul.f32 0.01, %v1295_v25  ;;  %v942_v48 = vmul.f32 1.442695, %v838_v54  ;;  %v4088_v56 = vmul.f32 100.0, %v4067_v30 }
 0x194   :  { %2736 = vlog2.f32 %v1314_v52  ;;  %v1665_v51 = vsel %vm768_vm6, %v3741_v36, %v1601_v0  ;;  %v1666_v3 = vsel %vm769_vm9, %v3832_v15, %v1602_v10  ;;  %vm767_vm12 = vcmp.gt.f32.partialorder %v3875_v37, 20.0 }
 0x195   :  { %2738 = vpow2.f32 %v946_v2  ;;  %v4097_v41 = vpop.eup %2730  ;;  %v1663_v9 = vsel %vm766_vm7, %v3818_v34, %v1599_v11  ;;  %v1712_v18 = vpack.c.bf16 %v1666_v3, %v1665_v51  ;;  %v1664_v22 = vsel %vm767_vm12, %v3836_v40, %v1600_v19  ;;  %v5064_v40 = vld [vmem:[#allocation23_spill] sm:$0xff] }
 0x196   :  { %2740 = vpow2.f32 %v942_v48  ;;  %v1711_v17 = vpack.c.bf16 %v1664_v22, %v1663_v9  ;;  %v1317_v36 = vmul.f32 -0.5, %v4069_v47  ;;  %v1341_v16 = vadd.f32 1.0, %v4097_v41  ;;  %v5070_v9 = vld [vmem:[#allocation25_spill] sm:$0xff] }
 0x197   :  { %v2733_v28 = vpop.eup %2732  ;;  %v1336_v15 = vadd.f32 1.0, %v1335_v59  ;;  %v841_v37 = vmin.f32 %v4088_v56, 20.0  ;;  %v4107_v43 = vmul.f32 100.0, %v4085_v49  ;;  %v4111_v29 = vadd.f32 %v3720_v50, %v3494_v5 }
 0x198   :  { %v1338_v34 = vand.u32 2147483647, %v4020_v35  ;;  %2742 = vlog2.f32 %v1341_v16  ;;  %v4116_v27 = vadd.f32 %v3720_v50, %v5064_v40  ;;  %2510 = vmatprep.mubr.msk.bf16.mxu1 %vm284_vm0, %v1711_v17  ;;  %v1334_v23 = vmul.f32 0.6931472, %v2733_v28 }
 0x199   :  { %v948_v1 = vmul.f32 1.442695, %v841_v37  ;;  %v839_v7 = vmin.f32 %v4107_v43, 20.0  ;;  %v1318_v61 = vadd.f32 1.0, %v1317_v36  ;;  %v4122_v14 = vmul.f32 100.0, %v4111_v29 }
 0x19a   :  { %vm772_vm13 = vcmp.gt.f32.partialorder %v3892_v6, 20.0  ;;  %v1337_v5 = vmul.f32 %v4020_v35, %v1336_v15  ;;  %v1344_v53 = vmul.f32 -0.5, %v4097_v41  ;;  %vm4127_vm14 = vcmp.lt.f32.partialorder %v1338_v34, 0.0004427343 }
 0x19b   :  { %2511 = vmatmul.mubr.msk.bf16.gmra.mrb[32].mxu1 %vm284_vm0, %v1712_v18  ;;  %2744 = vpow2.f32 %v948_v1  ;;  %v944_v60 = vmul.f32 1.442695, %v839_v7  ;;  %v1320_v44 = vand.u32 2147483647, %v4069_v47  ;;  %v844_v38 = vmin.f32 %v4122_v14, 20.0 }
 0x19c   :  { %v2735_v4 = vpop.eup %2734  ;;  %v4134_v0 = vmul.f32 100.0, %v4116_v27  ;;  %v1340_v35 = vsel %vm4127_vm14, %v1337_v5, %v1334_v23  ;;  %v4140_v33 = vadd.f32 %v3720_v50, %v5067_v20  ;;  %v1319_v54 = vmul.f32 %v4069_v47, %v1318_v61 }
 0x19d   :  { %v1323_v12 = vadd.f32 1.0, %v2735_v4  ;;  %2746 = vpow2.f32 %v944_v60  ;;  %v1347_v11 = vand.u32 2147483647, %v4097_v41  ;;  %v1326_v39 = vmul.f32 -0.5, %v2735_v4 }
 0x19e   :  { %v2737_v32 = vpop.eup %2736  ;;  %vm773_vm15 = vcmp.gt.f32.partialorder %v3975_v45, 20.0  ;;  %v1345_v52 = vadd.f32 1.0, %v1344_v53  ;;  %v954_v25 = vmul.f32 1.442695, %v844_v38  ;;  %v1605_v21 = vmul.f32 0.01, %v1340_v35 }
 0x19f   :  { %v2739_v26 = vpop.eup %2738  ;;  %v1316_v2 = vmul.f32 0.6931472, %v2737_v32  ;;  %2748 = vlog2.f32 %v1323_v12  ;;  %vm770_vm1 = vcmp.gt.f32.partialorder %v3931_v63, 20.0  ;;  %vm4148_vm2 = vcmp.lt.f32.partialorder %v1320_v44, 0.0004427343 }
 0x1a0   :  { %v4144_v59 = vpop.eup %2740  ;;  %v1368_v10 = vadd.f32 1.0, %v2739_v26  ;;  %v842_v48 = vmin.f32 %v4134_v0, 20.0  ;;  %v4157_v3 = vmul.f32 100.0, %v4140_v33  ;;  %v4161_v18 = vadd.f32 %v3720_v50, %v5070_v9 }
 0x1a1   :  { %v1350_v47 = vadd.f32 1.0, %v4144_v59  ;;  %v1322_v51 = vsel %vm4148_vm2, %v1319_v54, %v1316_v2  ;;  %vm4163_vm3 = vcmp.lt.f32.partialorder %v1347_v11, 0.0004427343  ;;  %v1327_v17 = vadd.f32 1.0, %v1326_v39 }
 0x1a2   :  { %2750 = vlog2.f32 %v1368_v10  ;;  %v2743_v22 = vpop.eup %2742  ;;  %v1329_v36 = vand.u32 2147483647, %v2735_v4  ;;  %v1346_v15 = vmul.f32 %v4097_v41, %v1345_v52  ;;  %v1371_v37 = vmul.f32 -0.5, %v2739_v26 }
 0x1a3   :  { %2752 = vlog2.f32 %v1350_v47  ;;  %v1343_v16 = vmul.f32 0.6931472, %v2743_v22  ;;  %v4171_v34 = vsel %vm772_vm13, %v3844_v31, %v1605_v21  ;;  %v1603_v40 = vmul.f32 0.01, %v1322_v51  ;;  %v5077_v47 = vld [vmem:[#allocation26_spill] sm:$0xff] }
 0x1a4   :  { %2754 = vpow2.f32 %v954_v25  ;;  %v1374_v23 = vand.u32 2147483647, %v2739_v26  ;;  %v950_v1 = vmul.f32 1.442695, %v842_v48  ;;  %v1353_v5 = vmul.f32 -0.5, %v4144_v59 }
 0x1a5   :  { %v4173_v7 = vpop.eup %2744  ;;  %v1349_v61 = vsel %vm4163_vm3, %v1346_v15, %v1343_v16  ;;  %v845_v53 = vmin.f32 %v4157_v3, 20.0  ;;  %v4180_v41 = vmul.f32 100.0, %v4161_v18  ;;  %vm771_vm4 = vcmp.gt.f32.partialorder %v4025_v13, 20.0 }
 0x1a6   :  { %v1606_v60 = vmul.f32 0.01, %v1349_v61  ;;  %v1328_v31 = vmul.f32 %v2735_v4, %v1327_v17  ;;  %vm4183_vm5 = vcmp.lt.f32.partialorder %v1329_v36, 0.0004427343  ;;  %v1377_v8 = vadd.f32 1.0, %v4173_v7 }
 0x1a7   :  { %v4188_v44 = vpop.eup %2746  ;;  %v1372_v38 = vadd.f32 1.0, %v1371_v37  ;;  %2756 = vpow2.f32 %v950_v1  ;;  %v956_v32 = vmul.f32 1.442695, %v845_v53  ;;  %v843_v35 = vmin.f32 %v4180_v41, 20.0 }
 0x1a8   :  { %v1670_v12 = vsel %vm773_vm15, %v3954_v42, %v1606_v60  ;;  %vm4194_vm6 = vcmp.lt.f32.partialorder %v1374_v23, 0.0004427343  ;;  %v1356_v4 = vand.u32 2147483647, %v4144_v59  ;;  %2758 = vlog2.f32 %v1377_v8 }
 0x1a9   :  { %v2749_v2 = vpop.eup %2748  ;;  %v1667_v54 = vsel %vm770_vm1, %v3856_v55, %v1603_v40  ;;  %v1714_v11 = vpack.c.bf16 %v1670_v12, %v4171_v34  ;;  %v1354_v39 = vadd.f32 1.0, %v1353_v5  ;;  %v1359_v52 = vadd.f32 1.0, %v4188_v44  ;;  %v5080_v34 = vld [vmem:[#allocation27_spill] sm:$0xff] }
 0x1aa   :  { %v1325_v10 = vmul.f32 0.6931472, %v2749_v2  ;;  %v1380_v42 = vmul.f32 -0.5, %v4173_v7  ;;  %2760 = vpow2.f32 %v956_v32  ;;  %v952_v45 = vmul.f32 1.442695, %v843_v35 }
 0x1ab   :  { %v1373_v21 = vmul.f32 %v2739_v26, %v1372_v38  ;;  %2762 = vlog2.f32 %v1359_v52  ;;  %v1362_v19 = vmul.f32 -0.5, %v4188_v44  ;;  %v4208_v48 = vadd.f32 %v3720_v50, %v5077_v47 }
 0x1ac   :  { %v2751_v25 = vpop.eup %2750  ;;  %v1331_v63 = vsel %vm4183_vm5, %v1328_v31, %v1325_v10  ;;  %vm4212_vm7 = vcmp.lt.f32.partialorder %v1356_v4, 0.0004427343  ;;  %2764 = vpow2.f32 %v952_v45  ;;  %vm776_vm8 = vcmp.gt.f32.partialorder %v4034_v58, 20.0 }
 0x1ad   :  { %v2753_v55 = vpop.eup %2752  ;;  %v1370_v51 = vmul.f32 0.6931472, %v2751_v25  ;;  %v1604_v28 = vmul.f32 0.01, %v1331_v63  ;;  %v1355_v17 = vmul.f32 %v4144_v59, %v1354_v39  ;;  %v4219_v36 = vmul.f32 100.0, %v4208_v48 }
 0x1ae   :  { %v2755_v22 = vpop.eup %2754  ;;  %v1352_v26 = vmul.f32 0.6931472, %v2753_v55  ;;  %v1381_v16 = vadd.f32 1.0, %v1380_v42  ;;  %v1383_v15 = vand.u32 2147483647, %v4173_v7  ;;  %v4224_v40 = vadd.f32 %v3720_v50, %v5080_v34 }
 0x1af   :  { %v1404_v37 = vadd.f32 1.0, %v2755_v22  ;;  %v1668_v23 = vsel %vm771_vm4, %v4007_v24, %v1604_v28  ;;  %v1376_v1 = vsel %vm4194_vm6, %v1373_v21, %v1370_v51  ;;  %v1363_v61 = vadd.f32 1.0, %v1362_v19  ;;  %v5087_v28 = vld [vmem:[#allocation28_spill] sm:$0xff] }
 0x1b0   :  { %v1365_v59 = vand.u32 2147483647, %v4188_v44  ;;  %v1713_v5 = vpack.c.bf16 %v1668_v23, %v1667_v54  ;;  %v1358_v53 = vsel %vm4212_vm7, %v1355_v17, %v1352_v26  ;;  %v1407_v60 = vmul.f32 -0.5, %v2755_v22 }
 0x1b1   :  { %2766 = vlog2.f32 %v1404_v37  ;;  %v4234_v31 = vpop.eup %2756  ;;  %vm774_vm9 = vcmp.gt.f32.partialorder %v4041_v46, 20.0  ;;  %vm777_vm10 = vcmp.gt.f32.partialorder %v4088_v56, 20.0  ;;  %v1410_v13 = vand.u32 2147483647, %v2755_v22 }
 0x1b2   :  { %v848_v24 = vmin.f32 %v4219_v36, 20.0  ;;  %v2759_v6 = vpop.eup %2758  ;;  %v1609_v8 = vmul.f32 0.01, %v1376_v1  ;;  %vm4239_vm11 = vcmp.lt.f32.partialorder %v1383_v15, 0.0004427343  ;;  %vm775_vm12 = vcmp.gt.f32.partialorder %v4107_v43, 20.0  ;;  %2514 = vmatprep.mubr.msk.bf16.mxu1 %vm284_vm0, %v1713_v5 }
 0x1b3   :  { %v1386_v32 = vadd.f32 1.0, %v4234_v31  ;;  %v4246_v35 = vmul.f32 100.0, %v4224_v40  ;;  %v1607_v12 = vmul.f32 0.01, %v1358_v53  ;;  %v1379_v20 = vmul.f32 0.6931472, %v2759_v6  ;;  %2515 = vmatmul.mubr.msk.bf16.gmra.mrb[36].mxu1 %vm284_vm0, %v1714_v11 }
 0x1b4   :  { %v1382_v4 = vmul.f32 %v4173_v7, %v1381_v16  ;;  %vm4250_vm13 = vcmp.lt.f32.partialorder %v1365_v59, 0.0004427343  ;;  %v4255_v54 = vpop.eup %2760  ;;  %v1364_v39 = vmul.f32 %v4188_v44, %v1363_v61  ;;  %v1408_v52 = vadd.f32 1.0, %v1407_v60  ;;  %v5090_v61 = vld [vmem:[#allocation29_spill] sm:$0xff]  ;;  %v5091_v60 = vld [vmem:[#allocation30_spill] sm:$0xff] }
 0x1b5   :  { %2768 = vlog2.f32 %v1386_v32  ;;  %v1389_v10 = vmul.f32 -0.5, %v4234_v31  ;;  %v2763_v42 = vpop.eup %2762  ;;  %vm4261_vm14 = vcmp.lt.f32.partialorder %v1410_v13, 0.0004427343  ;;  %v1392_v25 = vand.u32 2147483647, %v4234_v31 }
 0x1b6   :  { %v1385_v45 = vsel %vm4239_vm11, %v1382_v4, %v1379_v20  ;;  %v1413_v11 = vadd.f32 1.0, %v4255_v54  ;;  %v962_v21 = vmul.f32 1.442695, %v848_v24  ;;  %v4267_v19 = vpop.eup %2764  ;;  %v1673_v44 = vsel %vm776_vm8, %v4011_v62, %v1609_v8  ;;  %v5093_v4 = vld [vmem:[#allocation32_spill] sm:$0xff] }
 0x1b7   :  { %v1610_v47 = vmul.f32 0.01, %v1385_v45  ;;  %v1361_v55 = vmul.f32 0.6931472, %v2763_v42  ;;  %v846_v63 = vmin.f32 %v4246_v35, 20.0  ;;  %v1671_v51 = vsel %vm774_vm9, %v4015_v57, %v1607_v12  ;;  %v5092_v12 = vld [vmem:[#allocation31_spill] sm:$0xff] }
 0x1b8   :  { %2770 = vlog2.f32 %v1413_v11  ;;  %v1395_v9 = vadd.f32 1.0, %v4267_v19  ;;  %v4279_v26 = vadd.f32 %v3720_v50, %v5087_v28  ;;  %v1409_v17 = vmul.f32 %v2755_v22, %v1408_v52 }
 0x1b9   :  { %v1674_v58 = vsel %vm777_vm10, %v4067_v30, %v1610_v47  ;;  %v1367_v62 = vsel %vm4250_vm13, %v1364_v39, %v1361_v55  ;;  %v1390_v16 = vadd.f32 1.0, %v1389_v10  ;;  %v1416_v57 = vmul.f32 -0.5, %v4255_v54 }
 0x1ba   :  { %v1716_v15 = vpack.c.bf16 %v1674_v58, %v1673_v44  ;;  %v1608_v37 = vmul.f32 0.01, %v1367_v62  ;;  %2772 = vlog2.f32 %v1395_v9  ;;  %vm4287_vm15 = vcmp.lt.f32.partialorder %v1392_v25, 0.0004427343 }
 0x1bb   :  { %v2767_v46 = vpop.eup %2766  ;;  %v1419_v23 = vand.u32 2147483647, %v4255_v54  ;;  %2774 = vpow2.f32 %v962_v21  ;;  %v958_v56 = vmul.f32 1.442695, %v846_v63  ;;  %v4296_v1 = vmul.f32 100.0, %v4279_v26 }
 0x1bc   :  { %v1672_v30 = vsel %vm775_vm12, %v4085_v49, %v1608_v37  ;;  %v1406_v22 = vmul.f32 0.6931472, %v2767_v46  ;;  %v4300_v59 = vadd.f32 %v3720_v50, %v5090_v61  ;;  %v1398_v53 = vmul.f32 -0.5, %v4267_v19 }
 0x1bd   :  { %v1715_v5 = vpack.c.bf16 %v1672_v30, %v1671_v51  ;;  %2776 = vpow2.f32 %v958_v56  ;;  %v4305_v13 = vadd.f32 %v3720_v50, %v5091_v60  ;;  %vm780_vm1 = vcmp.gt.f32.partialorder %v4122_v14, 20.0 }
 0x1be   :  { %v1417_v43 = vadd.f32 1.0, %v1416_v57  ;;  %v1401_v49 = vand.u32 2147483647, %v4267_v19  ;;  %v849_v24 = vmin.f32 %v4296_v1, 20.0  ;;  %v4311_v6 = vmul.f32 100.0, %v4300_v59 }
 0x1bf   :  { %v2769_v8 = vpop.eup %2768  ;;  %v1412_v38 = vsel %vm4261_vm14, %v1409_v17, %v1406_v22  ;;  %v4316_v32 = vmul.f32 100.0, %v4305_v13  ;;  %v4320_v20 = vadd.f32 %v3720_v50, %v5092_v12  ;;  %v4324_v2 = vadd.f32 %v3720_v50, %v5093_v4  ;;  %2518 = vmatprep.mubr.msk.bf16.mxu1 %vm284_vm0, %v1715_v5  ;;  %v5098_v17 = vld [vmem:[#allocation33_spill] sm:$0xff] }
 0x1c0   :  { %v1388_v39 = vmul.f32 0.6931472, %v2769_v8  ;;  %v1391_v52 = vmul.f32 %v4234_v31, %v1390_v16  ;;  %v964_v10 = vmul.f32 1.442695, %v849_v24  ;;  %v847_v42 = vmin.f32 %v4311_v6, 20.0  ;;  %2519 = vmatmul.mubr.msk.bf16.gmra.mrb[40].mxu1 %vm284_vm0, %v1716_v15  ;;  %v5099_v8 = vld [vmem:[#allocation34_spill] sm:$0xff] }
 0x1c1   :  { %vm4330_vm2 = vcmp.lt.f32.partialorder %v1419_v23, 0.0004427343  ;;  %v1399_v7 = vadd.f32 1.0, %v1398_v53  ;;  %v852_v25 = vmin.f32 %v4316_v32, 20.0  ;;  %v4336_v11 = vmul.f32 100.0, %v4320_v20 }
 0x1c2   :  { %v2771_v21 = vpop.eup %2770  ;;  %v1613_v44 = vmul.f32 0.01, %v1412_v38  ;;  %v1418_v47 = vmul.f32 %v4255_v54, %v1417_v43  ;;  %2778 = vpow2.f32 %v964_v10  ;;  %v960_v31 = vmul.f32 1.442695, %v847_v42 }
 0x1c3   :  { %v1394_v55 = vsel %vm4287_vm15, %v1391_v52, %v1388_v39  ;;  %v1415_v63 = vmul.f32 0.6931472, %v2771_v21  ;;  %v970_v51 = vmul.f32 1.442695, %v852_v25  ;;  %v4342_v9 = vmul.f32 100.0, %v4324_v2  ;;  %v5100_v25 = vld [vmem:[#allocation35_spill] sm:$0xff] }
 0x1c4   :  { %v2773_v28 = vpop.eup %2772  ;;  %vm4344_vm3 = vcmp.lt.f32.partialorder %v1401_v49, 0.0004427343  ;;  %2780 = vpow2.f32 %v960_v31  ;;  %v850_v62 = vmin.f32 %v4336_v11, 20.0  ;;  %v4351_v54 = vadd.f32 %v3720_v50, %v5098_v17  ;;  %v5112_v17 = vld [vmem:[#allocation2_spill] sm:$0xff] }
 0x1c5   :  { %v4353_v16 = vpop.eup %2774  ;;  %v1421_v15 = vsel %vm4330_vm2, %v1418_v47, %v1415_v63  ;;  %v1397_v37 = vmul.f32 0.6931472, %v2773_v28  ;;  %v1400_v57 = vmul.f32 %v4267_v19, %v1399_v7  ;;  %2782 = vpow2.f32 %v970_v51 }
 0x1c6   :  { %v1611_v46 = vmul.f32 0.01, %v1394_v55  ;;  %vm781_vm4 = vcmp.gt.f32.partialorder %v4157_v3, 20.0  ;;  %v1614_v34 = vmul.f32 0.01, %v1421_v15  ;;  %v1440_v23 = vadd.f32 1.0, %v4353_v16 }
 0x1c7   :  { %v4360_v56 = vpop.eup %2776  ;;  %v1677_v50 = vsel %vm780_vm1, %v4111_v29, %v1613_v44  ;;  %v1403_v30 = vsel %vm4344_vm3, %v1400_v57, %v1397_v37  ;;  %v966_v22 = vmul.f32 1.442695, %v850_v62  ;;  %v853_v61 = vmin.f32 %v4342_v9, 20.0 }
 0x1c8   :  { %v1678_v19 = vsel %vm781_vm4, %v4140_v33, %v1614_v34  ;;  %v1612_v5 = vmul.f32 0.01, %v1403_v30  ;;  %2784 = vlog2.f32 %v1440_v23  ;;  %v4370_v3 = vmul.f32 100.0, %v4351_v54 }
 0x1c9   :  { %vm778_vm5 = vcmp.gt.f32.partialorder %v4134_v0, 20.0  ;;  %v1718_v53 = vpack.c.bf16 %v1678_v19, %v1677_v50  ;;  %vm779_vm6 = vcmp.gt.f32.partialorder %v4180_v41, 20.0  ;;  %v1422_v29 = vadd.f32 1.0, %v4360_v56  ;;  %v4381_v0 = vld [vmem:[%s4913_s2] ss:$0 sm:$0xff] }
 0x1ca   :  { %v1675_v14 = vsel %vm778_vm5, %v4116_v27, %v1611_v46  ;;  %v1676_v60 = vsel %vm779_vm6, %v4161_v18, %v1612_v5  ;;  %2786 = vpow2.f32 %v966_v22  ;;  %v972_v33 = vmul.f32 1.442695, %v853_v61 }
 0x1cb   :  { %v1717_v43 = vpack.c.bf16 %v1676_v60, %v1675_v14  ;;  %2788 = vlog2.f32 %v1422_v29  ;;  %v851_v24 = vmin.f32 %v4370_v3, 20.0  ;;  %v4385_v41 = vadd.f32 %v4381_v0, %v5099_v8  ;;  %v5105_v29 = vld [vmem:[#allocation36_spill] sm:$0xff] }
 0x1cc   :  { %v2779_v49 = vpop.eup %2778  ;;  %v1443_v18 = vmul.f32 -0.5, %v4353_v16  ;;  %v1446_v12 = vand.u32 2147483647, %v4353_v16  ;;  %v1425_v4 = vmul.f32 -0.5, %v4360_v56  ;;  %2790 = vpow2.f32 %v972_v33 }
 0x1cd   :  { %v1449_v38 = vadd.f32 1.0, %v2779_v49  ;;  %2522 = vmatprep.mubr.msk.bf16.mxu1 %vm284_vm0, %v1717_v43  ;;  %v968_v10 = vmul.f32 1.442695, %v851_v24  ;;  %v4393_v42 = vmul.f32 100.0, %v4385_v41  ;;  %v1428_v45 = vand.u32 2147483647, %v4360_v56 }
 0x1ce   :  { %v2781_v27 = vpop.eup %2780  ;;  %2523 = vmatmul.mubr.msk.bf16.gmra.mrb[44].mxu1 %vm284_vm0, %v1718_v53  ;;  %v4398_v21 = vadd.f32 %v4381_v0, %v5100_v25  ;;  %v1452_v44 = vmul.f32 -0.5, %v2779_v49  ;;  %v1444_v31 = vadd.f32 1.0, %v1443_v18  ;;  %vm4400_vm7 = vcmp.lt.f32.partialorder %v1446_v12, 0.0004427343 }
 0x1cf   :  { %v2783_v39 = vpop.eup %2782  ;;  %2792 = vlog2.f32 %v1449_v38  ;;  %v1431_v52 = vadd.f32 1.0, %v2781_v27  ;;  %v1426_v63 = vadd.f32 1.0, %v1425_v4  ;;  %v1434_v51 = vmul.f32 -0.5, %v2781_v27 }
 0x1d0   :  { %v1476_v7 = vadd.f32 1.0, %v2783_v39  ;;  %v856_v28 = vmin.f32 %v4393_v42, 20.0  ;;  %vm4407_vm8 = vcmp.lt.f32.partialorder %v1428_v45, 0.0004427343  ;;  %v1479_v15 = vmul.f32 -0.5, %v2783_v39 }
 0x1d1   :  { %2794 = vlog2.f32 %v1431_v52  ;;  %v4412_v37 = vmul.f32 100.0, %v4398_v21  ;;  %v1453_v46 = vadd.f32 1.0, %v1452_v44  ;;  %v1455_v34 = vand.u32 2147483647, %v2779_v49 }
 0x1d2   :  { %v2785_v47 = vpop.eup %2784  ;;  %2796 = vlog2.f32 %v1476_v7  ;;  %v1437_v23 = vand.u32 2147483647, %v2781_v27  ;;  %vm784_vm9 = vcmp.gt.f32.partialorder %v4219_v36, 20.0  ;;  %v1445_v30 = vmul.f32 %v4353_v16, %v1444_v31 }
 0x1d3   :  { %2798 = vpow2.f32 %v968_v10  ;;  %v1442_v62 = vmul.f32 0.6931472, %v2785_v47  ;;  %vm785_vm10 = vcmp.gt.f32.partialorder %v4296_v1, 20.0  ;;  %v1482_v61 = vand.u32 2147483647, %v2783_v39 }
 0x1d4   :  { %v4405_v58 = vpop.eup %2786  ;;  %v978_v19 = vmul.f32 1.442695, %v856_v28  ;;  %v1427_v5 = vmul.f32 %v4360_v56, %v1426_v63  ;;  %v1435_v53 = vadd.f32 1.0, %v1434_v51  ;;  %v4421_v14 = vadd.f32 %v4381_v0, %v5105_v29 }
 0x1d5   :  { %v2789_v57 = vpop.eup %2788  ;;  %v1458_v50 = vadd.f32 1.0, %v4405_v58  ;;  %v1448_v43 = vsel %vm4400_vm7, %v1445_v30, %v1442_v62  ;;  %vm782_vm11 = vcmp.gt.f32.partialorder %v4246_v35, 20.0  ;;  %vm783_vm12 = vcmp.gt.f32.partialorder %v4311_v6, 20.0 }
 0x1d6   :  { %v1424_v22 = vmul.f32 0.6931472, %v2789_v57  ;;  %v4423_v60 = vpop.eup %2790  ;;  %v1480_v16 = vadd.f32 1.0, %v1479_v15  ;;  %v854_v33 = vmin.f32 %v4412_v37, 20.0  ;;  %v1454_v24 = vmul.f32 %v2779_v49, %v1453_v46 }
 0x1d7   :  { %2800 = vlog2.f32 %v1458_v50  ;;  %vm4430_vm13 = vcmp.lt.f32.partialorder %v1455_v34, 0.0004427343  ;;  %vm4434_vm14 = vcmp.lt.f32.partialorder %v1437_v23, 0.0004427343  ;;  %v1485_v18 = vadd.f32 1.0, %v4423_v60 }
 0x1d8   :  { %2802 = vpow2.f32 %v978_v19  ;;  %v1430_v12 = vsel %vm4407_vm8, %v1427_v5, %v1424_v22  ;;  %vm4441_vm15 = vcmp.lt.f32.partialorder %v1482_v61, 0.0004427343  ;;  %v974_v10 = vmul.f32 1.442695, %v854_v33  ;;  %v5113_v19 = vld [vmem:[#allocation6_spill] sm:$0xff] }
 0x1d9   :  { %v2793_v56 = vpop.eup %2792  ;;  %v1617_v45 = vmul.f32 0.01, %v1448_v43  ;;  %v1436_v7 = vmul.f32 %v2781_v27, %v1435_v53  ;;  %2804 = vlog2.f32 %v1485_v18  ;;  %v4446_v25 = vmul.f32 100.0, %v4421_v14 }
 0x1da   :  { %v1451_v4 = vmul.f32 0.6931472, %v2793_v56  ;;  %v1481_v55 = vmul.f32 %v2783_v39, %v1480_v16  ;;  %2806 = vpow2.f32 %v974_v10  ;;  %v1615_v51 = vmul.f32 0.01, %v1430_v12 }
 0x1db   :  { %v2795_v49 = vpop.eup %2794  ;;  %v1461_v62 = vmul.f32 -0.5, %v4405_v58  ;;  %v4455_v27 = vadd.f32 %v4381_v0, %v5112_v17  ;;  %v1488_v46 = vmul.f32 -0.5, %v4423_v60  ;;  %v1681_v39 = vsel %vm784_vm9, %v4208_v48, %v1617_v45 }
 0x1dc   :  { %v2797_v44 = vpop.eup %2796  ;;  %v1457_v47 = vsel %vm4430_vm13, %v1454_v24, %v1451_v4  ;;  %v1433_v31 = vmul.f32 0.6931472, %v2795_v49  ;;  %v857_v30 = vmin.f32 %v4446_v25, 20.0  ;;  %v1464_v61 = vand.u32 2147483647, %v4405_v58 }
 0x1dd   :  { %v4450_v63 = vpop.eup %2798  ;;  %v1618_v28 = vmul.f32 0.01, %v1457_v47  ;;  %v1478_v57 = vmul.f32 0.6931472, %v2797_v44  ;;  %v4471_v5 = vadd.f32 %v4381_v0, %v5113_v19  ;;  %v1679_v48 = vsel %vm782_vm11, %v4224_v40, %v1615_v51 }
 0x1de   :  { %v1439_v15 = vsel %vm4434_vm14, %v1436_v7, %v1433_v31  ;;  %v1467_v34 = vadd.f32 1.0, %v4450_v63  ;;  %v4480_v1 = vmul.f32 100.0, %v4455_v27  ;;  %v1462_v33 = vadd.f32 1.0, %v1461_v62 }
 0x1df   :  { %v1682_v23 = vsel %vm785_vm10, %v4279_v26, %v1618_v28  ;;  %v1616_v50 = vmul.f32 0.01, %v1439_v15  ;;  %v980_v26 = vmul.f32 1.442695, %v857_v30  ;;  %v1484_v16 = vsel %vm4441_vm15, %v1481_v55, %v1478_v57  ;;  %v5117_v57 = vld [vmem:[#allocation9_spill] sm:$0xff] }
 0x1e0   :  { %v1720_v22 = vpack.c.bf16 %v1682_v23, %v1681_v39  ;;  %2808 = vlog2.f32 %v1467_v34  ;;  %v1489_v56 = vadd.f32 1.0, %v1488_v46  ;;  %v1491_v24 = vand.u32 2147483647, %v4423_v60  ;;  %v5118_v34 = vld [vmem:[#allocation10_spill] sm:$0xff] }
 0x1e1   :  { %v2801_v53 = vpop.eup %2800  ;;  %v1680_v36 = vsel %vm783_vm12, %v4300_v59, %v1616_v50  ;;  %v1470_v40 = vmul.f32 -0.5, %v4450_v63  ;;  %2810 = vpow2.f32 %v980_v26  ;;  %vm788_vm1 = vcmp.gt.f32.partialorder %v4316_v32, 20.0 }
 0x1e2   :  { %v4482_v29 = vpop.eup %2802  ;;  %v1719_v43 = vpack.c.bf16 %v1680_v36, %v1679_v48  ;;  %vm789_vm2 = vcmp.gt.f32.partialorder %v4342_v9, 20.0  ;;  %v855_v59 = vmin.f32 %v4480_v1, 20.0  ;;  %v4493_v6 = vmul.f32 100.0, %v4471_v5 }
 0x1e3   :  { %v1512_v35 = vadd.f32 1.0, %v4482_v29  ;;  %v2805_v8 = vpop.eup %2804  ;;  %v1621_v38 = vmul.f32 0.01, %v1484_v16  ;;  %v1460_v18 = vmul.f32 0.6931472, %v2801_v53  ;;  %v1490_v10 = vmul.f32 %v4423_v60, %v1489_v56  ;;  %v5116_v60 = vld [vmem:[#allocation5_spill] sm:$0xff] }
 0x1e4   :  { %2526 = vmatprep.mubr.msk.bf16.mxu1 %vm284_vm0, %v1719_v43  ;;  %vm4496_vm3 = vcmp.lt.f32.partialorder %v1464_v61, 0.0004427343  ;;  %v4501_v4 = vpop.eup %2806  ;;  %v1487_v52 = vmul.f32 0.6931472, %v2805_v8  ;;  %v976_v49 = vmul.f32 1.442695, %v855_v59  ;;  %v1463_v7 = vmul.f32 %v4405_v58, %v1462_v33 }
 0x1e5   :  { %2527 = vmatmul.mubr.msk.bf16.gmra.mrb[48].mxu1 %vm284_vm0, %v1720_v22  ;;  %v860_v45 = vmin.f32 %v4493_v6, 20.0  ;;  %vm1492_vm4 = vcmp.lt.f32.partialorder %v1491_v24, 0.0004427343  ;;  %v1471_v44 = vadd.f32 1.0, %v1470_v40  ;;  %2812 = vlog2.f32 %v1512_v35 }
 0x1e6   :  { %v1493_v47 = vsel %vm1492_vm4, %v1490_v10, %v1487_v52  ;;  %v1473_v31 = vand.u32 2147483647, %v4450_v63  ;;  %2814 = vpow2.f32 %v976_v49  ;;  %v1466_v51 = vsel %vm4496_vm3, %v1463_v7, %v1460_v18 }
 0x1e7   :  { %v986_v55 = vmul.f32 1.442695, %v860_v45  ;;  %v1622_v28 = vmul.f32 0.01, %v1493_v47  ;;  %v1494_v62 = vadd.f32 1.0, %v4501_v4  ;;  %v4512_v17 = vadd.f32 %v4381_v0, %v5116_v60 }
 0x1e8   :  { %v1685_v58 = vsel %vm788_vm1, %v4305_v13, %v1621_v38  ;;  %v4519_v46 = vadd.f32 %v4381_v0, %v5117_v57  ;;  %v4523_v39 = vadd.f32 %v4381_v0, %v5118_v34  ;;  %v1472_v30 = vmul.f32 %v4450_v63, %v1471_v44 }
 0x1e9   :  { %2816 = vpow2.f32 %v986_v55  ;;  %v1686_v23 = vsel %vm789_vm2, %v4324_v2, %v1622_v28  ;;  %v4530_v22 = vmul.f32 100.0, %v4512_v17  ;;  %v1619_v13 = vmul.f32 0.01, %v1466_v51 }
 0x1ea   :  { %v2809_v15 = vpop.eup %2808  ;;  %v1722_v32 = vpack.c.bf16 %v1686_v23, %v1685_v58  ;;  %vm1474_vm5 = vcmp.lt.f32.partialorder %v1473_v31, 0.0004427343  ;;  %v4533_v61 = vmul.f32 100.0, %v4519_v46  ;;  %2818 = vlog2.f32 %v1494_v62 }
 0x1eb   :  { %v1469_v50 = vmul.f32 0.6931472, %v2809_v15  ;;  %v2811_v19 = vpop.eup %2810  ;;  %v858_v0 = vmin.f32 %v4530_v22, 20.0  ;;  %v1515_v2 = vmul.f32 -0.5, %v4482_v29  ;;  %v4538_v63 = vmul.f32 100.0, %v4523_v39 }
 0x1ec   :  { %v1521_v9 = vadd.f32 1.0, %v2811_v19  ;;  %vm786_vm6 = vcmp.gt.f32.partialorder %v4336_v11, 20.0  ;;  %vm787_vm7 = vcmp.gt.f32.partialorder %v4370_v3, 20.0  ;;  %v861_v26 = vmin.f32 %v4533_v61, 20.0 }
 0x1ed   :  { %v1475_v53 = vsel %vm1474_vm5, %v1472_v30, %v1469_v50  ;;  %v982_v36 = vmul.f32 1.442695, %v858_v0  ;;  %v1683_v43 = vsel %vm786_vm6, %v4320_v20, %v1619_v13  ;;  %v1516_v35 = vadd.f32 1.0, %v1515_v2 }
 0x1ee   :  { %v1620_v48 = vmul.f32 0.01, %v1475_v53  ;;  %2820 = vlog2.f32 %v1521_v9  ;;  %v988_v24 = vmul.f32 1.442695, %v861_v26  ;;  %v859_v59 = vmin.f32 %v4538_v63, 20.0 }
 0x1ef   :  { %v2813_v33 = vpop.eup %2812  ;;  %2822 = vpow2.f32 %v982_v36  ;;  %v1518_v11 = vand.u32 2147483647, %v4482_v29  ;;  %v1524_v8 = vmul.f32 -0.5, %v2811_v19  ;;  %v1517_v12 = vmul.f32 %v4482_v29, %v1516_v35 }
 0x1f0   :  { %v1684_v16 = vsel %vm787_vm7, %v4351_v54, %v1620_v48  ;;  %v2815_v40 = vpop.eup %2814  ;;  %v1514_v20 = vmul.f32 0.6931472, %v2813_v33  ;;  %v1497_v54 = vmul.f32 -0.5, %v4501_v4  ;;  %2824 = vpow2.f32 %v988_v24 }
 0x1f1   :  { %v1721_v56 = vpack.c.bf16 %v1684_v16, %v1683_v43  ;;  %v1503_v3 = vadd.f32 1.0, %v2815_v40  ;;  %v984_v18 = vmul.f32 1.442695, %v859_v59  ;;  %vm1519_vm8 = vcmp.lt.f32.partialorder %v1518_v11, 0.0004427343 }
 0x1f2   :  { %v1525_v49 = vadd.f32 1.0, %v1524_v8  ;;  %v1520_v45 = vsel %vm1519_vm8, %v1517_v12, %v1514_v20  ;;  %v1498_v7 = vadd.f32 1.0, %v1497_v54  ;;  %v1527_v44 = vand.u32 2147483647, %v2811_v19 }
 0x1f3   :  { %2530 = vmatprep.mubr.msk.bf16.mxu1 %vm284_vm0, %v1721_v56  ;;  %v4548_v38 = vpop.eup %2816  ;;  %2826 = vlog2.f32 %v1503_v3  ;;  %v1506_v47 = vmul.f32 -0.5, %v2815_v40  ;;  %v1500_v31 = vand.u32 2147483647, %v4501_v4  ;;  %v1625_v62 = vmul.f32 0.01, %v1520_v45 }
 0x1f4   :  { %2531 = vmatmul.mubr.msk.bf16.gmra.mrb[52].mxu1 %vm284_vm0, %v1722_v32  ;;  %v1548_v52 = vadd.f32 1.0, %v4548_v38  ;;  %v2819_v10 = vpop.eup %2818  ;;  %2828 = vpow2.f32 %v984_v18  ;;  %v1526_v15 = vmul.f32 %v2811_v19, %v1525_v49  ;;  %v1499_v29 = vmul.f32 %v4501_v4, %v1498_v7 }
 0x1f5   :  { %v1496_v51 = vmul.f32 0.6931472, %v2819_v10  ;;  %vm1528_vm9 = vcmp.lt.f32.partialorder %v1527_v44, 0.0004427343  ;;  %v1507_v58 = vadd.f32 1.0, %v1506_v47  ;;  %vm792_vm11 = vcmp.gt.f32.partialorder %v4393_v42, 20.0 }
 0x1f6   :  { %2830 = vlog2.f32 %v1548_v52  ;;  %vm4556_vm10 = vcmp.lt.f32.partialorder %v1500_v31, 0.0004427343  ;;  %v1509_v50 = vand.u32 2147483647, %v2815_v40  ;;  %v1689_v4 = vsel %vm792_vm11, %v4385_v41, %v1625_v62 }
 0x1f7   :  { %v1502_v13 = vsel %vm4556_vm10, %v1499_v29, %v1496_v51  ;;  %vm793_vm12 = vcmp.gt.f32.partialorder %v4446_v25, 20.0  ;;  %v1508_v2 = vmul.f32 %v2815_v40, %v1507_v58  ;;  %v1551_v9 = vmul.f32 -0.5, %v4548_v38 }
 0x1f8   :  { %v2821_v55 = vpop.eup %2820  ;;  %v1623_v26 = vmul.f32 0.01, %v1502_v13  ;;  %vm1510_vm13 = vcmp.lt.f32.partialorder %v1509_v50, 0.0004427343  ;;  %vm790_vm14 = vcmp.gt.f32.partialorder %v4412_v37, 20.0  ;;  %vm791_vm15 = vcmp.gt.f32.partialorder %v4480_v1, 20.0 }
 0x1f9   :  { %v2823_v28 = vpop.eup %2822  ;;  %v1523_v60 = vmul.f32 0.6931472, %v2821_v55  ;;  %v1552_v25 = vadd.f32 1.0, %v1551_v9  ;;  %v1554_v35 = vand.u32 2147483647, %v4548_v38  ;;  %vm796_vm4 = vcmp.gt.f32.partialorder %v4493_v6, 20.0 }
 0x1fa   :  { %v1530_v57 = vadd.f32 1.0, %v2823_v28  ;;  %v2825_v30 = vpop.eup %2824  ;;  %v1533_v56 = vmul.f32 -0.5, %v2823_v28  ;;  %v1687_v24 = vsel %vm790_vm14, %v4398_v21, %v1623_v26  ;;  %v1536_v54 = vand.u32 2147483647, %v2823_v28 }
 0x1fb   :  { %v1529_v23 = vsel %vm1528_vm9, %v1526_v15, %v1523_v60  ;;  %v1557_v53 = vadd.f32 1.0, %v2825_v30  ;;  %v1553_v37 = vmul.f32 %v4548_v38, %v1552_v25  ;;  %vm1555_vm1 = vcmp.lt.f32.partialorder %v1554_v35, 0.0004427343 }
 0x1fc   :  { %v1626_v32 = vmul.f32 0.01, %v1529_v23  ;;  %2832 = vlog2.f32 %v1530_v57  ;;  %v1534_v8 = vadd.f32 1.0, %v1533_v56  ;;  %v1563_v12 = vand.u32 2147483647, %v2825_v30 }
 0x1fd   :  { %v2827_v19 = vpop.eup %2826  ;;  %2834 = vlog2.f32 %v1557_v53  ;;  %vm1537_vm2 = vcmp.lt.f32.partialorder %v1536_v54, 0.0004427343  ;;  %vm797_vm5 = vcmp.gt.f32.partialorder %v4533_v61, 20.0  ;;  %vm794_vm7 = vcmp.gt.f32.partialorder %v4530_v22, 20.0 }
 0x1fe   :  { %v1690_v0 = vsel %vm793_vm12, %v4421_v14, %v1626_v32  ;;  %v1505_v48 = vmul.f32 0.6931472, %v2827_v19  ;;  %v2829_v36 = vpop.eup %2828  ;;  %v1560_v14 = vmul.f32 -0.5, %v2825_v30  ;;  %v1535_v52 = vmul.f32 %v2823_v28, %v1534_v8 }
 0x1ff   :  { %v1724_v42 = vpack.c.bf16 %v1690_v0, %v1689_v4  ;;  %v1539_v16 = vadd.f32 1.0, %v2829_v36  ;;  %v1542_v3 = vmul.f32 -0.5, %v2829_v36  ;;  %v1545_v7 = vand.u32 2147483647, %v2829_v36 }
 0x200   :  { %v1511_v43 = vsel %vm1510_vm13, %v1508_v2, %v1505_v48  ;;  %v2831_v33 = vpop.eup %2830  ;;  %v1561_v18 = vadd.f32 1.0, %v1560_v14  ;;  %vm1564_vm3 = vcmp.lt.f32.partialorder %v1563_v12, 0.0004427343  ;;  %vm795_vm8 = vcmp.gt.f32.partialorder %v4538_v63, 20.0 }
 0x201   :  { %v1624_v41 = vmul.f32 0.01, %v1511_v43  ;;  %2836 = vlog2.f32 %v1539_v16  ;;  %v1550_v11 = vmul.f32 0.6931472, %v2831_v33  ;;  %v1543_v10 = vadd.f32 1.0, %v1542_v3 }
 0x202   :  { %v1562_v45 = vmul.f32 %v2825_v30, %v1561_v18  ;;  %vm1546_vm6 = vcmp.lt.f32.partialorder %v1545_v7, 0.0004427343  ;;  %vm2151_vm9 = vcmask 130048  }
 0x203   :  { %v1688_v40 = vsel %vm791_vm15, %v4455_v27, %v1624_v41  ;;  %v1556_v21 = vsel %vm1555_vm1, %v1553_v37, %v1550_v11  ;;  %v1544_v62 = vmul.f32 %v2829_v36, %v1543_v10 }
 0x204   :  { %v1723_v59 = vpack.c.bf16 %v1688_v40, %v1687_v24  ;;  %v1629_v44 = vmul.f32 0.01, %v1556_v21 }
 0x206   :  { %v2833_v20 = vpop.eup %2832  ;;  %2534 = vmatprep.mubr.msk.bf16.mxu1 %vm284_vm0, %v1723_v59  ;;  %v1693_v28 = vsel %vm796_vm4, %v4471_v5, %v1629_v44  ;;  %v4588_v5 = vld [vmem:[%s4914_s4] ss:$0 sm:$0xff] }
 0x207   :  { %v1532_v1 = vmul.f32 0.6931472, %v2833_v20  ;;  %2535 = vmatmul.mubr.msk.bf16.gmra.mrb[56].mxu1 %vm284_vm0, %v1724_v42  ;;  %v2835_v27 = vpop.eup %2834 }
 0x208   :  { %v1559_v49 = vmul.f32 0.6931472, %v2835_v27 }
 0x209   :  { %v1538_v47 = vsel %vm1537_vm2, %v1535_v52, %v1532_v1 }
 0x20a   :  { %v1565_v31 = vsel %vm1564_vm3, %v1562_v45, %v1559_v49  ;;  %v1627_v60 = vmul.f32 0.01, %v1538_v47 }
 0x20b   :  { %v2837_v38 = vpop.eup %2836  ;;  %v1630_v55 = vmul.f32 0.01, %v1565_v31 }
 0x20c   :  { %v1541_v51 = vmul.f32 0.6931472, %v2837_v38  ;;  %v1691_v34 = vsel %vm794_vm7, %v4512_v17, %v1627_v60 }
 0x20d   :  { %v1694_v15 = vsel %vm797_vm5, %v4519_v46, %v1630_v55 }
 0x20e   :  { %v1547_v29 = vsel %vm1546_vm6, %v1544_v62, %v1541_v51  ;;  %v1726_v58 = vpack.c.bf16 %v1694_v15, %v1693_v28 }
 0x20f   :  { %v1628_v57 = vmul.f32 0.01, %v1547_v29 }
 0x211   :  { %v1692_v23 = vsel %vm795_vm8, %v4523_v39, %v1628_v57 }
 0x212   :  { %v1725_v6 = vpack.c.bf16 %v1692_v23, %v1691_v34 }
 0x214   :  { %2538 = vmatprep.mubr.msk.bf16.mxu1 %vm284_vm0, %v1725_v6 }
 0x215   :  { %2539 = vmatmul.mubr.msk.bf16.gmra.mrb[60].mxu1 %vm284_vm0, %v1726_v58 }
 0x22e   :  { %v2480_v46 = vpop.f32.mrb[0].mxu1 }
 0x22f   :  { %v1905_v22 = vadd.f32 %v2480_v46, %v4588_v5  ;;  %v1896_v61 = vpop.f32.mrb[1].mxu1 }
 0x230   :  { %v1897_v63 = vadd.f32 %v4588_v5, %v1896_v61  ;;  %v2481_v17 = vpop.f32.mrb[2].mxu1 }
 0x231   :  { %2154 = vst.msk [vmem:[%s4915_s5 + $0x10] sm:$0xff] %vm2151_vm9, %v1905_v22  ;;  %v1908_v39 = vadd.f32 %v2481_v17, %v4588_v5  ;;  %v1899_v50 = vpop.f32.mrb[3].mxu1 }
 0x232   :  { %2152 = vst.msk [vmem:[%s4915_s5] sm:$0xff] %vm2151_vm9, %v1897_v63  ;;  %v1900_v30 = vadd.f32 %v4588_v5, %v1899_v50 }
 0x233   :  { %2155 = vst.msk [vmem:[%s4915_s5 + $0x18] sm:$0xff] %vm2151_vm9, %v1908_v39 }
 0x234   :  { %2153 = vst.msk [vmem:[%s4915_s5 + $0x8] sm:$0xff] %vm2151_vm9, %v1900_v30 }
 0x236   :  { %v2484_v13 = vpop.f32.mrb[4].mxu1 }
 0x237   :  { %v1921_v32 = vadd.f32 %v2484_v13, %v4588_v5  ;;  %v1912_v19 = vpop.f32.mrb[5].mxu1 }
 0x238   :  { %v1913_v4 = vadd.f32 %v4588_v5, %v1912_v19  ;;  %v2485_v53 = vpop.f32.mrb[6].mxu1 }
 0x239   :  { %2158 = vst.msk [vmem:[%s4915_s5 + $0x30] sm:$0xff] %vm2151_vm9, %v1921_v32  ;;  %v1924_v0 = vadd.f32 %v2485_v53, %v4588_v5  ;;  %v1915_v48 = vpop.f32.mrb[7].mxu1 }
 0x23a   :  { %2156 = vst.msk [vmem:[%s4915_s5 + $0x20] sm:$0xff] %vm2151_vm9, %v1913_v4  ;;  %v1916_v2 = vadd.f32 %v4588_v5, %v1915_v48 }
 0x23b   :  { %2159 = vst.msk [vmem:[%s4915_s5 + $0x38] sm:$0xff] %vm2151_vm9, %v1924_v0 }
 0x23c   :  { %2157 = vst.msk [vmem:[%s4915_s5 + $0x28] sm:$0xff] %vm2151_vm9, %v1916_v2 }
 0x23e   :  { %v2488_v9 = vpop.f32.mrb[8].mxu1 }
 0x23f   :  { %v1937_v36 = vadd.f32 %v2488_v9, %v4588_v5  ;;  %v1928_v26 = vpop.f32.mrb[9].mxu1 }
 0x240   :  { %v1929_v42 = vadd.f32 %v4588_v5, %v1928_v26  ;;  %v2489_v43 = vpop.f32.mrb[10].mxu1 }
 0x241   :  { %2162 = vst.msk [vmem:[%s4915_s5 + $0x50] sm:$0xff] %vm2151_vm9, %v1937_v36  ;;  %v1940_v16 = vadd.f32 %v2489_v43, %v4588_v5  ;;  %v1931_v33 = vpop.f32.mrb[11].mxu1 }
 0x242   :  { %2160 = vst.msk [vmem:[%s4915_s5 + $0x40] sm:$0xff] %vm2151_vm9, %v1929_v42  ;;  %v1932_v41 = vadd.f32 %v4588_v5, %v1931_v33 }
 0x243   :  { %2163 = vst.msk [vmem:[%s4915_s5 + $0x58] sm:$0xff] %vm2151_vm9, %v1940_v16 }
 0x244   :  { %2161 = vst.msk [vmem:[%s4915_s5 + $0x48] sm:$0xff] %vm2151_vm9, %v1932_v41 }
 0x246   :  { %v2492_v56 = vpop.f32.mrb[12].mxu1 }
 0x247   :  { %v1953_v25 = vadd.f32 %v2492_v56, %v4588_v5  ;;  %v1944_v14 = vpop.f32.mrb[13].mxu1 }
 0x248   :  { %v1945_v24 = vadd.f32 %v4588_v5, %v1944_v14  ;;  %v2493_v40 = vpop.f32.mrb[14].mxu1 }
 0x249   :  { %2166 = vst.msk [vmem:[%s4915_s5 + $0x70] sm:$0xff] %vm2151_vm9, %v1953_v25  ;;  %v1956_v35 = vadd.f32 %v2493_v40, %v4588_v5  ;;  %v1947_v59 = vpop.f32.mrb[15].mxu1 }
 0x24a   :  { %2164 = vst.msk [vmem:[%s4915_s5 + $0x60] sm:$0xff] %vm2151_vm9, %v1945_v24  ;;  %v1948_v11 = vadd.f32 %v4588_v5, %v1947_v59 }
 0x24b   :  { %2167 = vst.msk [vmem:[%s4915_s5 + $0x78] sm:$0xff] %vm2151_vm9, %v1956_v35 }
 0x24c   :  { %2165 = vst.msk [vmem:[%s4915_s5 + $0x68] sm:$0xff] %vm2151_vm9, %v1948_v11 }
 0x24e   :  { %v2496_v8 = vpop.f32.mrb[16].mxu1 }
 0x24f   :  { %v1969_v3 = vadd.f32 %v2496_v8, %v4588_v5  ;;  %v1960_v20 = vpop.f32.mrb[17].mxu1 }
 0x250   :  { %v1961_v37 = vadd.f32 %v4588_v5, %v1960_v20  ;;  %v2497_v54 = vpop.f32.mrb[18].mxu1 }
 0x251   :  { %2170 = vst.msk [vmem:[%s4915_s5 + $0x90] sm:$0xff] %vm2151_vm9, %v1969_v3  ;;  %v1972_v18 = vadd.f32 %v2497_v54, %v4588_v5  ;;  %v1963_v1 = vpop.f32.mrb[19].mxu1 }
 0x252   :  { %2168 = vst.msk [vmem:[%s4915_s5 + $0x80] sm:$0xff] %vm2151_vm9, %v1961_v37  ;;  %v1964_v12 = vadd.f32 %v4588_v5, %v1963_v1 }
 0x253   :  { %2171 = vst.msk [vmem:[%s4915_s5 + $0x98] sm:$0xff] %vm2151_vm9, %v1972_v18 }
 0x254   :  { %2169 = vst.msk [vmem:[%s4915_s5 + $0x88] sm:$0xff] %vm2151_vm9, %v1964_v12 }
 0x256   :  { %v2500_v21 = vpop.f32.mrb[20].mxu1 }
 0x257   :  { %v1985_v27 = vadd.f32 %v2500_v21, %v4588_v5  ;;  %v1976_v52 = vpop.f32.mrb[21].mxu1 }
 0x258   :  { %v1977_v10 = vadd.f32 %v4588_v5, %v1976_v52  ;;  %v2501_v49 = vpop.f32.mrb[22].mxu1 }
 0x259   :  { %2174 = vst.msk [vmem:[%s4915_s5 + $0xb0] sm:$0xff] %vm2151_vm9, %v1985_v27  ;;  %v1988_v45 = vadd.f32 %v2501_v49, %v4588_v5  ;;  %v1979_v7 = vpop.f32.mrb[23].mxu1 }
 0x25a   :  { %2172 = vst.msk [vmem:[%s4915_s5 + $0xa0] sm:$0xff] %vm2151_vm9, %v1977_v10  ;;  %v1980_v44 = vadd.f32 %v4588_v5, %v1979_v7 }
 0x25b   :  { %2175 = vst.msk [vmem:[%s4915_s5 + $0xb8] sm:$0xff] %vm2151_vm9, %v1988_v45 }
 0x25c   :  { %2173 = vst.msk [vmem:[%s4915_s5 + $0xa8] sm:$0xff] %vm2151_vm9, %v1980_v44 }
 0x25e   :  { %v2504_v47 = vpop.f32.mrb[24].mxu1 }
 0x25f   :  { %v2001_v38 = vadd.f32 %v2504_v47, %v4588_v5  ;;  %v1992_v31 = vpop.f32.mrb[25].mxu1 }
 0x260   :  { %v1993_v55 = vadd.f32 %v4588_v5, %v1992_v31  ;;  %v2505_v51 = vpop.f32.mrb[26].mxu1 }
 0x261   :  { %2178 = vst.msk [vmem:[%s4915_s5 + $0xd0] sm:$0xff] %vm2151_vm9, %v2001_v38  ;;  %v2004_v62 = vadd.f32 %v2505_v51, %v4588_v5  ;;  %v1995_v60 = vpop.f32.mrb[27].mxu1 }
 0x262   :  { %2176 = vst.msk [vmem:[%s4915_s5 + $0xc0] sm:$0xff] %vm2151_vm9, %v1993_v55  ;;  %v1996_v28 = vadd.f32 %v4588_v5, %v1995_v60 }
 0x263   :  { %2179 = vst.msk [vmem:[%s4915_s5 + $0xd8] sm:$0xff] %vm2151_vm9, %v2004_v62 }
 0x264   :  { %2177 = vst.msk [vmem:[%s4915_s5 + $0xc8] sm:$0xff] %vm2151_vm9, %v1996_v28 }
 0x266   :  { %v2508_v15 = vpop.f32.mrb[28].mxu1 }
 0x267   :  { %v2017_v29 = vadd.f32 %v2508_v15, %v4588_v5  ;;  %v2008_v58 = vpop.f32.mrb[29].mxu1 }
 0x268   :  { %v2009_v57 = vadd.f32 %v4588_v5, %v2008_v58  ;;  %v2509_v34 = vpop.f32.mrb[30].mxu1 }
 0x269   :  { %2182 = vst.msk [vmem:[%s4915_s5 + $0xf0] sm:$0xff] %vm2151_vm9, %v2017_v29  ;;  %v2020_v23 = vadd.f32 %v2509_v34, %v4588_v5  ;;  %v2011_v6 = vpop.f32.mrb[31].mxu1 }
 0x26a   :  { %2180 = vst.msk [vmem:[%s4915_s5 + $0xe0] sm:$0xff] %vm2151_vm9, %v2009_v57  ;;  %v2012_v46 = vadd.f32 %v4588_v5, %v2011_v6 }
 0x26b   :  { %2183 = vst.msk [vmem:[%s4915_s5 + $0xf8] sm:$0xff] %vm2151_vm9, %v2020_v23 }
 0x26c   :  { %2181 = vst.msk [vmem:[%s4915_s5 + $0xe8] sm:$0xff] %vm2151_vm9, %v2012_v46 }
 0x26e   :  { %v2512_v22 = vpop.f32.mrb[32].mxu1 }
 0x26f   :  { %v2033_v61 = vadd.f32 %v2512_v22, %v4588_v5  ;;  %v2024_v63 = vpop.f32.mrb[33].mxu1 }
 0x270   :  { %v2025_v17 = vadd.f32 %v4588_v5, %v2024_v63  ;;  %v2513_v39 = vpop.f32.mrb[34].mxu1 }
 0x271   :  { %2186 = vst.msk [vmem:[%s4915_s5 + $0x110] sm:$0xff] %vm2151_vm9, %v2033_v61  ;;  %v2036_v50 = vadd.f32 %v2513_v39, %v4588_v5  ;;  %v2027_v30 = vpop.f32.mrb[35].mxu1 }
 0x272   :  { %2184 = vst.msk [vmem:[%s4915_s5 + $0x100] sm:$0xff] %vm2151_vm9, %v2025_v17  ;;  %v2028_v13 = vadd.f32 %v4588_v5, %v2027_v30 }
 0x273   :  { %2187 = vst.msk [vmem:[%s4915_s5 + $0x118] sm:$0xff] %vm2151_vm9, %v2036_v50 }
 0x274   :  { %2185 = vst.msk [vmem:[%s4915_s5 + $0x108] sm:$0xff] %vm2151_vm9, %v2028_v13 }
 0x286   :  { %v2516_v32 = vpop.f32.mrb[36].mxu1 }
 0x287   :  { %v2049_v19 = vadd.f32 %v2516_v32, %v4588_v5  ;;  %v2040_v4 = vpop.f32.mrb[37].mxu1 }
 0x288   :  { %v2041_v53 = vadd.f32 %v4588_v5, %v2040_v4  ;;  %v2517_v0 = vpop.f32.mrb[38].mxu1 }
 0x289   :  { %2190 = vst.msk [vmem:[%s4915_s5 + $0x130] sm:$0xff] %vm2151_vm9, %v2049_v19  ;;  %v2052_v48 = vadd.f32 %v2517_v0, %v4588_v5  ;;  %v2043_v2 = vpop.f32.mrb[39].mxu1 }
 0x28a   :  { %2188 = vst.msk [vmem:[%s4915_s5 + $0x120] sm:$0xff] %vm2151_vm9, %v2041_v53  ;;  %v2044_v9 = vadd.f32 %v4588_v5, %v2043_v2 }
 0x28b   :  { %2191 = vst.msk [vmem:[%s4915_s5 + $0x138] sm:$0xff] %vm2151_vm9, %v2052_v48 }
 0x28c   :  { %2189 = vst.msk [vmem:[%s4915_s5 + $0x128] sm:$0xff] %vm2151_vm9, %v2044_v9 }
 0x293   :  { %v2520_v36 = vpop.f32.mrb[40].mxu1 }
 0x294   :  { %v2065_v26 = vadd.f32 %v2520_v36, %v4588_v5  ;;  %v2056_v42 = vpop.f32.mrb[41].mxu1 }
 0x295   :  { %v2057_v43 = vadd.f32 %v4588_v5, %v2056_v42  ;;  %v2521_v16 = vpop.f32.mrb[42].mxu1 }
 0x296   :  { %2194 = vst.msk [vmem:[%s4915_s5 + $0x150] sm:$0xff] %vm2151_vm9, %v2065_v26  ;;  %v2068_v33 = vadd.f32 %v2521_v16, %v4588_v5  ;;  %v2059_v41 = vpop.f32.mrb[43].mxu1 }
 0x297   :  { %2192 = vst.msk [vmem:[%s4915_s5 + $0x140] sm:$0xff] %vm2151_vm9, %v2057_v43  ;;  %v2060_v56 = vadd.f32 %v4588_v5, %v2059_v41 }
 0x298   :  { %2195 = vst.msk [vmem:[%s4915_s5 + $0x158] sm:$0xff] %vm2151_vm9, %v2068_v33 }
 0x299   :  { %2193 = vst.msk [vmem:[%s4915_s5 + $0x148] sm:$0xff] %vm2151_vm9, %v2060_v56 }
 0x2a1   :  { %v2524_v25 = vpop.f32.mrb[44].mxu1 }
 0x2a2   :  { %v2081_v14 = vadd.f32 %v2524_v25, %v4588_v5  ;;  %v2072_v24 = vpop.f32.mrb[45].mxu1 }
 0x2a3   :  { %v2073_v40 = vadd.f32 %v4588_v5, %v2072_v24  ;;  %v2525_v35 = vpop.f32.mrb[46].mxu1 }
 0x2a4   :  { %2198 = vst.msk [vmem:[%s4915_s5 + $0x170] sm:$0xff] %vm2151_vm9, %v2081_v14  ;;  %v2084_v59 = vadd.f32 %v2525_v35, %v4588_v5  ;;  %v2075_v11 = vpop.f32.mrb[47].mxu1 }
 0x2a5   :  { %2196 = vst.msk [vmem:[%s4915_s5 + $0x160] sm:$0xff] %vm2151_vm9, %v2073_v40  ;;  %v2076_v8 = vadd.f32 %v4588_v5, %v2075_v11 }
 0x2a6   :  { %2199 = vst.msk [vmem:[%s4915_s5 + $0x178] sm:$0xff] %vm2151_vm9, %v2084_v59 }
 0x2a7   :  { %2197 = vst.msk [vmem:[%s4915_s5 + $0x168] sm:$0xff] %vm2151_vm9, %v2076_v8 }
 0x2b8   :  { %v2528_v3 = vpop.f32.mrb[48].mxu1 }
 0x2b9   :  { %v2097_v20 = vadd.f32 %v2528_v3, %v4588_v5  ;;  %v2088_v37 = vpop.f32.mrb[49].mxu1 }
 0x2ba   :  { %v2089_v54 = vadd.f32 %v4588_v5, %v2088_v37  ;;  %v2529_v18 = vpop.f32.mrb[50].mxu1 }
 0x2bb   :  { %2202 = vst.msk [vmem:[%s4915_s5 + $0x190] sm:$0xff] %vm2151_vm9, %v2097_v20  ;;  %v2100_v1 = vadd.f32 %v2529_v18, %v4588_v5  ;;  %v2091_v12 = vpop.f32.mrb[51].mxu1 }
 0x2bc   :  { %2200 = vst.msk [vmem:[%s4915_s5 + $0x180] sm:$0xff] %vm2151_vm9, %v2089_v54  ;;  %v2092_v21 = vadd.f32 %v4588_v5, %v2091_v12 }
 0x2bd   :  { %2203 = vst.msk [vmem:[%s4915_s5 + $0x198] sm:$0xff] %vm2151_vm9, %v2100_v1 }
 0x2be   :  { %2201 = vst.msk [vmem:[%s4915_s5 + $0x188] sm:$0xff] %vm2151_vm9, %v2092_v21 }
 0x2c7   :  { %v2532_v27 = vpop.f32.mrb[52].mxu1 }
 0x2c8   :  { %v2113_v52 = vadd.f32 %v2532_v27, %v4588_v5  ;;  %v2104_v10 = vpop.f32.mrb[53].mxu1 }
 0x2c9   :  { %v2105_v49 = vadd.f32 %v4588_v5, %v2104_v10  ;;  %v2533_v45 = vpop.f32.mrb[54].mxu1 }
 0x2ca   :  { %2206 = vst.msk [vmem:[%s4915_s5 + $0x1b0] sm:$0xff] %vm2151_vm9, %v2113_v52  ;;  %v2116_v7 = vadd.f32 %v2533_v45, %v4588_v5  ;;  %v2107_v44 = vpop.f32.mrb[55].mxu1 }
 0x2cb   :  { %2204 = vst.msk [vmem:[%s4915_s5 + $0x1a0] sm:$0xff] %vm2151_vm9, %v2105_v49  ;;  %v2108_v47 = vadd.f32 %v4588_v5, %v2107_v44 }
 0x2cc   :  { %2207 = vst.msk [vmem:[%s4915_s5 + $0x1b8] sm:$0xff] %vm2151_vm9, %v2116_v7 }
 0x2cd   :  { %2205 = vst.msk [vmem:[%s4915_s5 + $0x1a8] sm:$0xff] %vm2151_vm9, %v2108_v47 }
 0x2da   :  { %v2536_v38 = vpop.f32.mrb[56].mxu1 }
 0x2db   :  { %v2129_v31 = vadd.f32 %v2536_v38, %v4588_v5  ;;  %v2120_v55 = vpop.f32.mrb[57].mxu1 }
 0x2dc   :  { %v2121_v51 = vadd.f32 %v4588_v5, %v2120_v55  ;;  %v2537_v62 = vpop.f32.mrb[58].mxu1 }
 0x2dd   :  { %2210 = vst.msk [vmem:[%s4915_s5 + $0x1d0] sm:$0xff] %vm2151_vm9, %v2129_v31  ;;  %v2132_v60 = vadd.f32 %v2537_v62, %v4588_v5  ;;  %v2123_v28 = vpop.f32.mrb[59].mxu1 }
 0x2de   :  { %2208 = vst.msk [vmem:[%s4915_s5 + $0x1c0] sm:$0xff] %vm2151_vm9, %v2121_v51  ;;  %v2124_v15 = vadd.f32 %v4588_v5, %v2123_v28 }
 0x2df   :  { %2211 = vst.msk [vmem:[%s4915_s5 + $0x1d8] sm:$0xff] %vm2151_vm9, %v2132_v60 }
 0x2e0   :  { %2209 = vst.msk [vmem:[%s4915_s5 + $0x1c8] sm:$0xff] %vm2151_vm9, %v2124_v15 }
 0x2e8   :  { %v2540_v29 = vpop.f32.mrb[60].mxu1 }
 0x2e9   :  { %v2145_v58 = vadd.f32 %v2540_v29, %v4588_v5  ;;  %v2136_v57 = vpop.f32.mrb[61].mxu1 }
 0x2ea   :  { %v2137_v34 = vadd.f32 %v4588_v5, %v2136_v57  ;;  %v2541_v23 = vpop.f32.mrb[62].mxu1 }
 0x2eb   :  { %2214 = vst.msk [vmem:[%s4915_s5 + $0x1f0] sm:$0xff] %vm2151_vm9, %v2145_v58  ;;  %v2148_v6 = vadd.f32 %v2541_v23, %v4588_v5  ;;  %v2139_v46 = vpop.f32.mrb[63].mxu1 }
 0x2ec   :  { %2212 = vst.msk [vmem:[%s4915_s5 + $0x1e0] sm:$0xff] %vm2151_vm9, %v2137_v34  ;;  %v2140_v22 = vadd.f32 %v4588_v5, %v2139_v46 }
 0x2ed   :  { %2215 = vst.msk [vmem:[%s4915_s5 + $0x1f8] sm:$0xff] %vm2151_vm9, %v2148_v6 }
 0x2ee   :  { %2213 = vst.msk [vmem:[%s4915_s5 + $0x1e8] sm:$0xff] %vm2151_vm9, %v2140_v22 }

</bundles_post_ra>
